<compile_context>
chip_gen: v6e
topology: v6e:2x2x1
jax: 0.10.0
libtpu: 0.0.40
codegen_flags: <defaults>
</compile_context>

<pallas_src>
import functools
import math

import jax
import jax.numpy as jnp
from jax import lax
from jax.experimental import pallas as pl
from jax.experimental.pallas import tpu as pltpu


# ----------------------------------------------------------------------------
# helpers
# ----------------------------------------------------------------------------
def _layernorm(v, scale, shift, eps=1e-5):
    mu = jnp.mean(v, axis=-1, keepdims=True)
    var = jnp.mean((v - mu) ** 2, axis=-1, keepdims=True)
    return (v - mu) * lax.rsqrt(var + eps) * scale + shift


def _vmem_limit(request_bytes):
    """Clamp a VMEM request to [32 MiB, 0.85 * physical VMEM]."""
    try:
        cap = int(pltpu.get_tpu_info().vmem_capacity_bytes)
    except Exception:
        cap = 64 * 1024 * 1024                      # conservative (v7x-sized)
    hi = int(cap * 0.85)
    lo = min(32 * 1024 * 1024, hi)
    return int(min(max(int(request_bytes), lo), hi))


def _pick_tile(n, target=2048, quantum=128):
    """Largest multiple-of-128 divisor of n that is <= target (else n itself)."""
    if n % quantum != 0 or n <= quantum:
        return n
    t = min(target, (n // quantum) * quantum)
    while n % t != 0:
        t -= quantum
    return t


# ----------------------------------------------------------------------------
# Transformer block kernel: grid = (batch, layer).
#   * batch is the outer PARALLEL axis (megacore sharding on v7x),
#   * layer is the inner ARBITRARY (serial) axis.
# The output BlockSpec index map is constant across the layer axis, so the
# output block stays VMEM-resident for the whole layer loop and acts as the
# residual-stream accumulator: x is consumed only at layer==0 and the result
# is written back to HBM only when the batch index advances.
# Weight block indices change every inner step, so the default double
# buffering overlaps the per-layer weight DMA with compute.
# ----------------------------------------------------------------------------
def transformer_block_kernel(x_ref, ln1s_ref, ln1b_ref,
                             wqkv_ref, wo_ref, bo_ref,
                             ln2s_ref, ln2b_ref,
                             w1_ref, b1_ref, w2_ref, b2_ref,
                             out_ref, *, num_heads):
    layer = pl.program_id(1)

    @pl.when(layer == 0)
    def _():
        out_ref[0] = x_ref[0]            # seed the residual with emb + pos enc

    x = out_ref[0]                       # (S, D) bf16 residual (VMEM resident)
    S, D = x.shape
    H = num_heads
    hd = D // H

    xf = x.astype(jnp.float32)

    # ---- attention sub-block (pre-LN) ----
    h = _layernorm(xf, ln1s_ref[0], ln1b_ref[0]).astype(jnp.bfloat16)
    qkv = jnp.dot(h, wqkv_ref[0], preferred_element_type=jnp.float32)  # (S, 3D)
    q = qkv[:, :D] * (1.0 / math.sqrt(hd))          # scale folded into q
    k = qkv[:, D:2 * D]
    v = qkv[:, 2 * D:]

    # head split via one reshape + one leading-dim transpose (no per-head
    # slicing / stack / concatenate)
    qh = jnp.transpose(q.astype(jnp.bfloat16).reshape(S, H, hd), (1, 0, 2))
    kh = jnp.transpose(k.astype(jnp.bfloat16).reshape(S, H, hd), (1, 0, 2))
    vh = jnp.transpose(v.astype(jnp.bfloat16).reshape(S, H, hd), (1, 0, 2))

    sc = jnp.einsum('hqd,hkd->hqk', qh, kh,
                    preferred_element_type=jnp.float32)          # (H, S, S)

    # causal mask built in-kernel (no (S,S) HBM input, no resident VMEM block)
    qpos = lax.broadcasted_iota(jnp.int32, (S, S), 0)
    kpos = lax.broadcasted_iota(jnp.int32, (S, S), 1)
    sc = jnp.where((kpos <= qpos)[None, :, :], sc, -1e30)

    sc = sc - jnp.max(sc, axis=-1, keepdims=True)
    p = jnp.exp(sc)
    p = p / jnp.sum(p, axis=-1, keepdims=True)       # exact denominator

    ctx = jnp.einsum('hqk,hkd->hqd', p.astype(jnp.bfloat16), vh,
                     preferred_element_type=jnp.float32)         # (H, S, hd)
    ctx = jnp.transpose(ctx, (1, 0, 2)).reshape(S, D).astype(jnp.bfloat16)

    attn = jnp.dot(ctx, wo_ref[0],
                   preferred_element_type=jnp.float32) + bo_ref[0]
    xf = xf + attn                       # TODO(synk): dropout skipped (eval mode)

    # ---- feed-forward sub-block (pre-LN) ----
    h2 = _layernorm(xf, ln2s_ref[0], ln2b_ref[0]).astype(jnp.bfloat16)
    f = jnp.dot(h2, w1_ref[0], preferred_element_type=jnp.float32) + b1_ref[0]
    # TODO(synk): torch nn.GELU defaults to exact erf; tanh approximation used.
    f = jax.nn.gelu(f, approximate=True).astype(jnp.bfloat16)
    f = jnp.dot(f, w2_ref[0], preferred_element_type=jnp.float32) + b2_ref[0]
    xf = xf + f

    out_ref[0] = xf.astype(jnp.bfloat16)             # residual back into the
                                                      # resident output block


# ----------------------------------------------------------------------------
# Final LayerNorm + vocab projection: grid = (batch, vocab-tile).  The LN'd
# hidden state is computed once per batch element (at the first vocab tile)
# into a VMEM scratch; vocab tiles are lane-dense multiples of 128 so the
# output store is an unmasked vst and weight tiles pipeline against the MXU.
# ----------------------------------------------------------------------------
def lm_head_kernel(x_ref, gs_ref, gb_ref, w_ref, b_ref, out_ref, hbuf):
    @pl.when(pl.program_id(1) == 0)
    def _():
        xf = x_ref[0].astype(jnp.float32)
        hbuf[...] = _layernorm(xf, gs_ref[...], gb_ref[...]).astype(jnp.bfloat16)

    logits = jnp.dot(hbuf[...], w_ref[...],
                     preferred_element_type=jnp.float32) + b_ref[...]
    out_ref[0] = logits.astype(out_ref.dtype)


# ----------------------------------------------------------------------------
# Wrappers
# ----------------------------------------------------------------------------
def run_transformer_blocks(x, p, num_heads):
    B, S, D = x.shape
    L = p["wqkv"].shape[0]
    Dff = p["w1"].shape[-1]

    act_map = lambda b, l: (b, 0, 0)     # noqa: E731 constant across layer axis
    w_map = lambda b, l: (l, 0, 0)       # noqa: E731 changes every inner step

    in_specs = [
        pl.BlockSpec((1, S, D), act_map),              # x (bf16), fetched once / b
        pl.BlockSpec((1, 1, D), w_map),                # ln1 scale
        pl.BlockSpec((1, 1, D), w_map),                # ln1 shift
        pl.BlockSpec((1, D, 3 * D), w_map),            # fused Wqkv
        pl.BlockSpec((1, D, D), w_map),                # Wo
        pl.BlockSpec((1, 1, D), w_map),                # bo
        pl.BlockSpec((1, 1, D), w_map),                # ln2 scale
        pl.BlockSpec((1, 1, D), w_map),                # ln2 shift
        pl.BlockSpec((1, D, Dff), w_map),              # W1
        pl.BlockSpec((1, 1, Dff), w_map),              # b1
        pl.BlockSpec((1, Dff, D), w_map),              # W2
        pl.BlockSpec((1, 1, D), w_map),                # b2
    ]

    # per-step VMEM footprint: double-buffered weight/act blocks + kernel temps
    weight_bytes = (4 * D * D + 2 * D * Dff) * 2 + (6 * D + Dff) * 4
    act_bytes = 2 * S * D * 2                          # x block + resident out block
    temp_bytes = (num_heads * S * S) * 6 \
        + S * 3 * D * 6 + S * Dff * 6 + 6 * S * D * 4
    request = 2 * (weight_bytes + act_bytes) + temp_bytes + (4 << 20)

    return pl.pallas_call(
        functools.partial(transformer_block_kernel, num_heads=num_heads),
        out_shape=jax.ShapeDtypeStruct((B, S, D), jnp.bfloat16),
        grid_spec=pltpu.PrefetchScalarGridSpec(
            num_scalar_prefetch=0,
            grid=(B, L),                               # batch outer, layer inner
            in_specs=in_specs,
            out_specs=pl.BlockSpec((1, S, D), act_map),
        ),
        # batch is truly parallel (megacore on v7x); layer must stay serial
        # because the residual accumulates in the resident output block.
        compiler_params=pltpu.CompilerParams(
            dimension_semantics=("parallel", "arbitrary"),
            vmem_limit_bytes=_vmem_limit(request)),
    )(x, p["ln1_s"], p["ln1_b"], p["wqkv"], p["wo"], p["bo"],
      p["ln2_s"], p["ln2_b"], p["w1"], p["b1"], p["w2"], p["b2"])


def run_lm_head(x, p):
    B, S, D = x.shape
    V = p["w_out"].shape[-1]
    TV = _pick_tile(V)

    request = (2 * (S * D * 2 + D * TV * 2 + TV * 4 + 2 * D * 4 + S * TV * 4)
               + S * D * 2 + 2 * S * TV * 4 + (2 << 20))

    return pl.pallas_call(
        lm_head_kernel,
        out_shape=jax.ShapeDtypeStruct((B, S, V), jnp.float32),
        grid_spec=pltpu.PrefetchScalarGridSpec(
            num_scalar_prefetch=0,
            grid=(B, V // TV),                         # vocab tiles inner
            in_specs=[
                pl.BlockSpec((1, S, D), lambda b, j: (b, 0, 0)),
                pl.BlockSpec((1, D), lambda b, j: (0, 0)),
                pl.BlockSpec((1, D), lambda b, j: (0, 0)),
                pl.BlockSpec((D, TV), lambda b, j: (0, j)),
                pl.BlockSpec((1, TV), lambda b, j: (0, j)),
            ],
            out_specs=pl.BlockSpec((1, S, TV), lambda b, j: (b, 0, j)),
            scratch_shapes=[pltpu.VMEM((S, D), jnp.bfloat16)],
        ),
        compiler_params=pltpu.CompilerParams(
            dimension_semantics=("parallel", "arbitrary"),
            vmem_limit_bytes=_vmem_limit(request)),
    )(x, p["fln_s"], p["fln_b"], p["w_out"], p["b_out"])


def sinusoidal_pe(seq_len, d):
    pos = jnp.arange(seq_len, dtype=jnp.float32)[:, None]
    i = jnp.arange(0, d, 2, dtype=jnp.float32)
    div = jnp.exp(-math.log(10000.0) * i / d)
    pe = jnp.zeros((seq_len, d), jnp.float32)
    pe = pe.at[:, 0::2].set(jnp.sin(pos * div))
    pe = pe.at[:, 1::2].set(jnp.cos(pos * div)[:, : d // 2])
    return pe


def init_params(key, cfg):
    V = cfg["vocabulary_size"]
    D = cfg["embedding_dimension"]
    L = cfg["number_layers"]
    Dff = 4 * D
    ks = jax.random.split(key, 7)

    def n(k, shape, dtype=jnp.bfloat16):
        return (0.02 * jax.random.normal(k, shape, jnp.float32)).astype(dtype)

    return {
        "emb": n(ks[0], (V, D)),                               # bf16
        "ln1_s": jnp.ones((L, 1, D), jnp.float32),
        "ln1_b": jnp.zeros((L, 1, D), jnp.float32),
        "wqkv": n(ks[1], (L, D, 3 * D)),                       # fused q,k,v
        "wo": n(ks[2], (L, D, D)),
        "bo": jnp.zeros((L, 1, D), jnp.float32),
        "ln2_s": jnp.ones((L, 1, D), jnp.float32),
        "ln2_b": jnp.zeros((L, 1, D), jnp.float32),
        "w1": n(ks[3], (L, D, Dff)),
        "b1": jnp.zeros((L, 1, Dff), jnp.float32),
        "w2": n(ks[4], (L, Dff, D)),
        "b2": jnp.zeros((L, 1, D), jnp.float32),
        "fln_s": jnp.ones((1, D), jnp.float32),
        "fln_b": jnp.zeros((1, D), jnp.float32),
        "w_out": n(ks[5], (D, V)),                             # bf16
        "b_out": (n(ks[6], (1, V), jnp.float32) if cfg["bias"]
                  else jnp.zeros((1, V), jnp.float32)),
    }


@functools.partial(jax.jit, static_argnames=("num_heads",))
def gpt_forward(tokens, params, num_heads):
    # TODO(synk): token-embedding gather + sinusoidal positional encoding are
    # plain-JAX glue (data-dependent gather has no rectangular BlockSpec);
    # dropout is identity in eval mode.
    B, S = tokens.shape
    D = params["emb"].shape[-1]
    x = jnp.take(params["emb"], tokens, axis=0).astype(jnp.float32)
    x = (x + sinusoidal_pe(S, D)[None]).astype(jnp.bfloat16)

    x = run_transformer_blocks(x, params, num_heads)   # Pallas
    return run_lm_head(x, params)                      # Pallas


# ----------------------------------------------------------------------------
# Pure-JAX reference mirroring the kernel's precision choices (for a sanity
# check in __main__ only).
# ----------------------------------------------------------------------------
def reference_forward(tokens, p, num_heads):
    B, S = tokens.shape
    D = p["emb"].shape[-1]
    H = num_heads
    hd = D // H
    L = p["wqkv"].shape[0]

    x = jnp.take(p["emb"], tokens, axis=0).astype(jnp.float32)
    x = (x + sinusoidal_pe(S, D)[None]).astype(jnp.bfloat16)
    mask = jnp.tril(jnp.ones((S, S), bool))

    for l in range(L):
        xf = x.astype(jnp.float32)
        h = _layernorm(xf, p["ln1_s"][l], p["ln1_b"][l]).astype(jnp.bfloat16)
        qkv = jnp.einsum('bsd,de->bse', h, p["wqkv"][l],
                         preferred_element_type=jnp.float32)
        q = qkv[..., :D] * (1.0 / math.sqrt(hd))
        k = qkv[..., D:2 * D]
        v = qkv[..., 2 * D:]
        qh = q.astype(jnp.bfloat16).reshape(B, S, H, hd).transpose(0, 2, 1, 3)
        kh = k.astype(jnp.bfloat16).reshape(B, S, H, hd).transpose(0, 2, 1, 3)
        vh = v.astype(jnp.bfloat16).reshape(B, S, H, hd).transpose(0, 2, 1, 3)
        sc = jnp.einsum('bhqd,bhkd->bhqk', qh, kh,
                        preferred_element_type=jnp.float32)
        sc = jnp.where(mask, sc, -1e30)
        sc = sc - sc.max(-1, keepdims=True)
        pr = jnp.exp(sc)
        pr = pr / pr.sum(-1, keepdims=True)
        ctx = jnp.einsum('bhqk,bhkd->bhqd', pr.astype(jnp.bfloat16), vh,
                         preferred_element_type=jnp.float32)
        ctx = ctx.transpose(0, 2, 1, 3).reshape(B, S, D).astype(jnp.bfloat16)
        attn = jnp.einsum('bsd,de->bse', ctx, p["wo"][l],
                          preferred_element_type=jnp.float32) + p["bo"][l]
        xf = xf + attn
        h2 = _layernorm(xf, p["ln2_s"][l], p["ln2_b"][l]).astype(jnp.bfloat16)
        f = jnp.einsum('bsd,df->bsf', h2, p["w1"][l],
                       preferred_element_type=jnp.float32) + p["b1"][l]
        f = jax.nn.gelu(f, approximate=True).astype(jnp.bfloat16)
        f = jnp.einsum('bsf,fd->bsd', f, p["w2"][l],
                       preferred_element_type=jnp.float32) + p["b2"][l]
        xf = xf + f
        x = xf.astype(jnp.bfloat16)

    xf = x.astype(jnp.float32)
    hN = _layernorm(xf, p["fln_s"], p["fln_b"]).astype(jnp.bfloat16)
    return jnp.einsum('bsd,dv->bsv', hN, p["w_out"],
                      preferred_element_type=jnp.float32) + p["b_out"]


if __name__ == "__main__":
    cfg = {
        "vocabulary_size": 128,
        "embedding_dimension": 32,
        "context_length": 8,
        "number_layers": 2,
        "number_heads": 4,
        "drop_rate": 0.0,
        "bias": True,
    }
    key = jax.random.PRNGKey(0)
    k_tok, k_par = jax.random.split(key)
    tokens = jax.random.randint(k_tok, (2, cfg["context_length"]), 0,
                                cfg["vocabulary_size"], dtype=jnp.int32)
    params = init_params(k_par, cfg)

    logits = gpt_forward(tokens, params, cfg["number_heads"])
    jax.block_until_ready(logits)

    assert logits.shape == (2, cfg["context_length"], cfg["vocabulary_size"])
    assert bool(jnp.all(jnp.isfinite(logits)))

    ref = reference_forward(tokens, params, cfg["number_heads"])
    assert bool(jnp.allclose(logits, ref, atol=2e-2, rtol=2e-2)), (
        float(jnp.max(jnp.abs(logits - ref))))

    print("KERNEL_OK")
</pallas_src>

<mosaic_0001>
module attributes {stable_mosaic.version = 11 : i64} {
  func.func @lm_head_kernel(%arg0: i32, %arg1: i32, %arg2: memref<1x8x32xbf16, #tpu.memory_space<vmem>>, %arg3: memref<1x32xf32, #tpu.memory_space<vmem>>, %arg4: memref<1x32xf32, #tpu.memory_space<vmem>>, %arg5: memref<32x128xbf16, #tpu.memory_space<vmem>>, %arg6: memref<1x128xf32, #tpu.memory_space<vmem>>, %arg7: memref<1x8x128xf32, #tpu.memory_space<vmem>>, %arg8: memref<8x32xbf16, #tpu.memory_space<vmem>>) attributes {dimension_semantics = [#tpu.dimension_semantics<parallel>, #tpu.dimension_semantics<arbitrary>], iteration_bounds = array<i64: 2, 1>, scalar_prefetch = 0 : i64, scratch_operands = 1 : i64, tpu.core_type = #tpu.core_type<tc>, window_params = [{transform_indices = @transform_0, window_bounds = array<i64: 1, 8, 32>}, {pipeline_mode = #tpu.pipeline_mode<synchronous>, transform_indices = @transform_1, window_bounds = array<i64: 1, 32>}, {pipeline_mode = #tpu.pipeline_mode<synchronous>, transform_indices = @transform_2, window_bounds = array<i64: 1, 32>}, {transform_indices = @transform_3, window_bounds = array<i64: 32, 128>}, {transform_indices = @transform_4, window_bounds = array<i64: 1, 128>}, {transform_indices = @transform_5, window_bounds = array<i64: 1, 8, 128>}]} {
    %c0_i32 = arith.constant 0 : i32
    %0 = arith.cmpi eq, %arg1, %c0_i32 : i32
    %1 = arith.extui %0 : i1 to i32
    %c0_i32_0 = arith.constant 0 : i32
    %2 = arith.cmpi ne, %1, %c0_i32_0 : i32
    scf.if %2 {
      %c0_9 = arith.constant 0 : index
      %c0_10 = arith.constant 0 : index
      %c0_11 = arith.constant 0 : index
      %12 = vector.load %arg2[%c0_9, %c0_10, %c0_11] : memref<1x8x32xbf16, #tpu.memory_space<vmem>>, vector<1x8x32xbf16>
      %13 = vector.shape_cast %12 : vector<1x8x32xbf16> to vector<8x32xbf16>
      %14 = arith.extf %13 : vector<8x32xbf16> to vector<8x32xf32>
      %c0_12 = arith.constant 0 : index
      %c0_13 = arith.constant 0 : index
      %15 = vector.load %arg3[%c0_12, %c0_13] : memref<1x32xf32, #tpu.memory_space<vmem>>, vector<1x32xf32>
      %c0_14 = arith.constant 0 : index
      %c0_15 = arith.constant 0 : index
      %16 = vector.load %arg4[%c0_14, %c0_15] : memref<1x32xf32, #tpu.memory_space<vmem>>, vector<1x32xf32>
      %cst_16 = arith.constant dense<0.000000e+00> : vector<8xf32>
      %17 = vector.multi_reduction <add>, %14, %cst_16 [1] : vector<8x32xf32> to vector<8xf32>
      %18 = vector.shape_cast %17 : vector<8xf32> to vector<8x1xf32>
      %cst_17 = arith.constant 3.200000e+01 : f32
      %19 = vector.broadcast %cst_17 : f32 to vector<8x1xf32>
      %20 = arith.divf %18, %19 : vector<8x1xf32>
      %21 = vector.broadcast %20 : vector<8x1xf32> to vector<8x32xf32>
      %22 = arith.subf %14, %21 : vector<8x32xf32>
      %23 = arith.mulf %22, %22 : vector<8x32xf32>
      %cst_18 = arith.constant dense<0.000000e+00> : vector<8xf32>
      %24 = vector.multi_reduction <add>, %23, %cst_18 [1] : vector<8x32xf32> to vector<8xf32>
      %25 = vector.shape_cast %24 : vector<8xf32> to vector<8x1xf32>
      %cst_19 = arith.constant 3.200000e+01 : f32
      %26 = vector.broadcast %cst_19 : f32 to vector<8x1xf32>
      %27 = arith.divf %25, %26 : vector<8x1xf32>
      %28 = vector.broadcast %20 : vector<8x1xf32> to vector<8x32xf32>
      %29 = arith.subf %14, %28 : vector<8x32xf32>
      %cst_20 = arith.constant 9.99999974E-6 : f32
      %30 = vector.broadcast %cst_20 : f32 to vector<8x1xf32>
      %31 = arith.addf %27, %30 : vector<8x1xf32>
      %32 = math.rsqrt %31 : vector<8x1xf32>
      %33 = vector.broadcast %32 : vector<8x1xf32> to vector<8x32xf32>
      %34 = arith.mulf %29, %33 : vector<8x32xf32>
      %35 = vector.broadcast %15 : vector<1x32xf32> to vector<8x32xf32>
      %36 = arith.mulf %34, %35 : vector<8x32xf32>
      %37 = vector.broadcast %16 : vector<1x32xf32> to vector<8x32xf32>
      %38 = arith.addf %36, %37 : vector<8x32xf32>
      %39 = arith.truncf %38 : vector<8x32xf32> to vector<8x32xbf16>
      %c0_21 = arith.constant 0 : index
      %c0_22 = arith.constant 0 : index
      %40 = vector.load %arg8[%c0_21, %c0_22] : memref<8x32xbf16, #tpu.memory_space<vmem>>, vector<8x32xbf16>
      tpu.vector_store %arg8[%c0_21, %c0_22], %39 {strides = array<i32>} : memref<8x32xbf16, #tpu.memory_space<vmem>>, vector<8x32xbf16>,
    } else {
    }
    %c0 = arith.constant 0 : index
    %c0_1 = arith.constant 0 : index
    %3 = vector.load %arg8[%c0, %c0_1] : memref<8x32xbf16, #tpu.memory_space<vmem>>, vector<8x32xbf16>
    %c0_2 = arith.constant 0 : index
    %c0_3 = arith.constant 0 : index
    %4 = vector.load %arg5[%c0_2, %c0_3] : memref<32x128xbf16, #tpu.memory_space<vmem>>, vector<32x128xbf16>
    %cst = arith.constant dense<0.000000e+00> : vector<8x128xf32>
    %5 = tpu.matmul %3, %4, %cst {dimension_numbers = #tpu.dot_dimension_numbers<[1], [0], [0], [1], [0, 0, 1, 1], [], []>} : vector<8x32xbf16>, vector<32x128xbf16>, vector<8x128xf32> -> vector<8x128xf32>
    %c0_4 = arith.constant 0 : index
    %c0_5 = arith.constant 0 : index
    %6 = vector.load %arg6[%c0_4, %c0_5] : memref<1x128xf32, #tpu.memory_space<vmem>>, vector<1x128xf32>
    %7 = vector.broadcast %6 : vector<1x128xf32> to vector<8x128xf32>
    %8 = arith.addf %5, %7 : vector<8x128xf32>
    %c0_6 = arith.constant 0 : index
    %c0_7 = arith.constant 0 : index
    %c0_8 = arith.constant 0 : index
    %9 = vector.load %arg7[%c0_6, %c0_7, %c0_8] : memref<1x8x128xf32, #tpu.memory_space<vmem>>, vector<1x8x128xf32>
    %10 = vector.shape_cast %9 : vector<1x8x128xf32> to vector<8x128xf32>
    %11 = vector.shape_cast %8 : vector<8x128xf32> to vector<1x8x128xf32>
    tpu.vector_store %arg7[%c0_6, %c0_7, %c0_8], %11 {strides = array<i32>} : memref<1x8x128xf32, #tpu.memory_space<vmem>>, vector<1x8x128xf32>,
    return
  }
  func.func @transform_0(%arg0: i32, %arg1: i32) -> (i32, i32, i32) {
    %c0_i32 = arith.constant 0 : i32
    %c0_i32_0 = arith.constant 0 : i32
    %c0_i32_1 = arith.constant 0 : i32
    return %arg0, %c0_i32, %c0_i32_0 : i32, i32, i32
  }
  func.func @transform_1(%arg0: i32, %arg1: i32) -> (i32, i32) {
    %c0_i32 = arith.constant 0 : i32
    %c0_i32_0 = arith.constant 0 : i32
    %c0_i32_1 = arith.constant 0 : i32
    return %c0_i32, %c0_i32_0 : i32, i32
  }
  func.func @transform_2(%arg0: i32, %arg1: i32) -> (i32, i32) {
    %c0_i32 = arith.constant 0 : i32
    %c0_i32_0 = arith.constant 0 : i32
    %c0_i32_1 = arith.constant 0 : i32
    return %c0_i32, %c0_i32_0 : i32, i32
  }
  func.func @transform_3(%arg0: i32, %arg1: i32) -> (i32, i32) {
    %c0_i32 = arith.constant 0 : i32
    %c0_i32_0 = arith.constant 0 : i32
    return %c0_i32, %arg1 : i32, i32
  }
  func.func @transform_4(%arg0: i32, %arg1: i32) -> (i32, i32) {
    %c0_i32 = arith.constant 0 : i32
    %c0_i32_0 = arith.constant 0 : i32
    return %c0_i32, %arg1 : i32, i32
  }
  func.func @transform_5(%arg0: i32, %arg1: i32) -> (i32, i32, i32) {
    %c0_i32 = arith.constant 0 : i32
    %c0_i32_0 = arith.constant 0 : i32
    return %arg0, %c0_i32, %arg1 : i32, i32, i32
  }
}

module attributes {stable_mosaic.version = 11 : i64} {
  func.func @transformer_block_kernel(%arg0: i32, %arg1: i32, %arg2: memref<1x8x32xbf16, #tpu.memory_space<vmem>>, %arg3: memref<1x1x32xf32, #tpu.memory_space<vmem>>, %arg4: memref<1x1x32xf32, #tpu.memory_space<vmem>>, %arg5: memref<1x32x96xbf16, #tpu.memory_space<vmem>>, %arg6: memref<1x32x32xbf16, #tpu.memory_space<vmem>>, %arg7: memref<1x1x32xf32, #tpu.memory_space<vmem>>, %arg8: memref<1x1x32xf32, #tpu.memory_space<vmem>>, %arg9: memref<1x1x32xf32, #tpu.memory_space<vmem>>, %arg10: memref<1x32x128xbf16, #tpu.memory_space<vmem>>, %arg11: memref<1x1x128xf32, #tpu.memory_space<vmem>>, %arg12: memref<1x128x32xbf16, #tpu.memory_space<vmem>>, %arg13: memref<1x1x32xf32, #tpu.memory_space<vmem>>, %arg14: memref<1x8x32xbf16, #tpu.memory_space<vmem>>) attributes {dimension_semantics = [#tpu.dimension_semantics<parallel>, #tpu.dimension_semantics<arbitrary>], iteration_bounds = array<i64: 2, 2>, scalar_prefetch = 0 : i64, scratch_operands = 0 : i64, tpu.core_type = #tpu.core_type<tc>, window_params = [{transform_indices = @transform_0, window_bounds = array<i64: 1, 8, 32>}, {transform_indices = @transform_1, window_bounds = array<i64: 1, 1, 32>}, {transform_indices = @transform_2, window_bounds = array<i64: 1, 1, 32>}, {transform_indices = @transform_3, window_bounds = array<i64: 1, 32, 96>}, {transform_indices = @transform_4, window_bounds = array<i64: 1, 32, 32>}, {transform_indices = @transform_5, window_bounds = array<i64: 1, 1, 32>}, {transform_indices = @transform_6, window_bounds = array<i64: 1, 1, 32>}, {transform_indices = @transform_7, window_bounds = array<i64: 1, 1, 32>}, {transform_indices = @transform_8, window_bounds = array<i64: 1, 32, 128>}, {transform_indices = @transform_9, window_bounds = array<i64: 1, 1, 128>}, {transform_indices = @transform_10, window_bounds = array<i64: 1, 128, 32>}, {transform_indices = @transform_11, window_bounds = array<i64: 1, 1, 32>}, {transform_indices = @transform_12, window_bounds = array<i64: 1, 8, 32>}]} {
    %c0_i32 = arith.constant 0 : i32
    %0 = arith.cmpi eq, %arg1, %c0_i32 : i32
    %1 = arith.extui %0 : i1 to i32
    %c0_i32_0 = arith.constant 0 : i32
    %2 = arith.cmpi ne, %1, %c0_i32_0 : i32
    scf.if %2 {
      %c0_62 = arith.constant 0 : index
      %c0_63 = arith.constant 0 : index
      %c0_64 = arith.constant 0 : index
      %141 = vector.load %arg2[%c0_62, %c0_63, %c0_64] : memref<1x8x32xbf16, #tpu.memory_space<vmem>>, vector<1x8x32xbf16>
      %142 = vector.shape_cast %141 : vector<1x8x32xbf16> to vector<8x32xbf16>
      %c0_65 = arith.constant 0 : index
      %c0_66 = arith.constant 0 : index
      %c0_67 = arith.constant 0 : index
      %143 = vector.load %arg14[%c0_65, %c0_66, %c0_67] : memref<1x8x32xbf16, #tpu.memory_space<vmem>>, vector<1x8x32xbf16>
      %144 = vector.shape_cast %143 : vector<1x8x32xbf16> to vector<8x32xbf16>
      %145 = vector.shape_cast %142 : vector<8x32xbf16> to vector<1x8x32xbf16>
      tpu.vector_store %arg14[%c0_65, %c0_66, %c0_67], %145 {strides = array<i32>} : memref<1x8x32xbf16, #tpu.memory_space<vmem>>, vector<1x8x32xbf16>,
    } else {
    }
    %c0 = arith.constant 0 : index
    %c0_1 = arith.constant 0 : index
    %c0_2 = arith.constant 0 : index
    %3 = vector.load %arg14[%c0, %c0_1, %c0_2] : memref<1x8x32xbf16, #tpu.memory_space<vmem>>, vector<1x8x32xbf16>
    %4 = vector.shape_cast %3 : vector<1x8x32xbf16> to vector<8x32xbf16>
    %5 = arith.extf %4 : vector<8x32xbf16> to vector<8x32xf32>
    %c0_3 = arith.constant 0 : index
    %c0_4 = arith.constant 0 : index
    %c0_5 = arith.constant 0 : index
    %6 = vector.load %arg3[%c0_3, %c0_4, %c0_5] : memref<1x1x32xf32, #tpu.memory_space<vmem>>, vector<1x1x32xf32>
    %7 = vector.shape_cast %6 : vector<1x1x32xf32> to vector<1x32xf32>
    %c0_6 = arith.constant 0 : index
    %c0_7 = arith.constant 0 : index
    %c0_8 = arith.constant 0 : index
    %8 = vector.load %arg4[%c0_6, %c0_7, %c0_8] : memref<1x1x32xf32, #tpu.memory_space<vmem>>, vector<1x1x32xf32>
    %9 = vector.shape_cast %8 : vector<1x1x32xf32> to vector<1x32xf32>
    %cst = arith.constant dense<0.000000e+00> : vector<8xf32>
    %10 = vector.multi_reduction <add>, %5, %cst [1] : vector<8x32xf32> to vector<8xf32>
    %11 = vector.shape_cast %10 : vector<8xf32> to vector<8x1xf32>
    %cst_9 = arith.constant 3.200000e+01 : f32
    %12 = vector.broadcast %cst_9 : f32 to vector<8x1xf32>
    %13 = arith.divf %11, %12 : vector<8x1xf32>
    %14 = vector.broadcast %13 : vector<8x1xf32> to vector<8x32xf32>
    %15 = arith.subf %5, %14 : vector<8x32xf32>
    %16 = arith.mulf %15, %15 : vector<8x32xf32>
    %cst_10 = arith.constant dense<0.000000e+00> : vector<8xf32>
    %17 = vector.multi_reduction <add>, %16, %cst_10 [1] : vector<8x32xf32> to vector<8xf32>
    %18 = vector.shape_cast %17 : vector<8xf32> to vector<8x1xf32>
    %cst_11 = arith.constant 3.200000e+01 : f32
    %19 = vector.broadcast %cst_11 : f32 to vector<8x1xf32>
    %20 = arith.divf %18, %19 : vector<8x1xf32>
    %21 = vector.broadcast %13 : vector<8x1xf32> to vector<8x32xf32>
    %22 = arith.subf %5, %21 : vector<8x32xf32>
    %cst_12 = arith.constant 9.99999974E-6 : f32
    %23 = vector.broadcast %cst_12 : f32 to vector<8x1xf32>
    %24 = arith.addf %20, %23 : vector<8x1xf32>
    %25 = math.rsqrt %24 : vector<8x1xf32>
    %26 = vector.broadcast %25 : vector<8x1xf32> to vector<8x32xf32>
    %27 = arith.mulf %22, %26 : vector<8x32xf32>
    %28 = vector.broadcast %7 : vector<1x32xf32> to vector<8x32xf32>
    %29 = arith.mulf %27, %28 : vector<8x32xf32>
    %30 = vector.broadcast %9 : vector<1x32xf32> to vector<8x32xf32>
    %31 = arith.addf %29, %30 : vector<8x32xf32>
    %32 = arith.truncf %31 : vector<8x32xf32> to vector<8x32xbf16>
    %c0_13 = arith.constant 0 : index
    %c0_14 = arith.constant 0 : index
    %c0_15 = arith.constant 0 : index
    %33 = vector.load %arg5[%c0_13, %c0_14, %c0_15] : memref<1x32x96xbf16, #tpu.memory_space<vmem>>, vector<1x32x96xbf16>
    %34 = vector.shape_cast %33 : vector<1x32x96xbf16> to vector<32x96xbf16>
    %cst_16 = arith.constant dense<0.000000e+00> : vector<8x96xf32>
    %35 = tpu.matmul %32, %34, %cst_16 {dimension_numbers = #tpu.dot_dimension_numbers<[1], [0], [0], [1], [0, 0, 1, 1], [], []>} : vector<8x32xbf16>, vector<32x96xbf16>, vector<8x96xf32> -> vector<8x96xf32>
    %36 = vector.extract_strided_slice %35 {offsets = [0, 0], sizes = [8, 32], strides = [1, 1]} : vector<8x96xf32> to vector<8x32xf32>
    %cst_17 = arith.constant 0.353553385 : f32
    %37 = vector.broadcast %cst_17 : f32 to vector<8x32xf32>
    %38 = arith.mulf %36, %37 : vector<8x32xf32>
    %39 = vector.extract_strided_slice %35 {offsets = [0, 32], sizes = [8, 32], strides = [1, 1]} : vector<8x96xf32> to vector<8x32xf32>
    %40 = vector.extract_strided_slice %35 {offsets = [0, 64], sizes = [8, 32], strides = [1, 1]} : vector<8x96xf32> to vector<8x32xf32>
    %41 = arith.truncf %38 : vector<8x32xf32> to vector<8x32xbf16>
    %42 = vector.shape_cast %41 : vector<8x32xbf16> to vector<8x4x8xbf16>
    %43 = tpu.transpose %42, [1, 0, 2] : vector<8x4x8xbf16> -> vector<4x8x8xbf16>
    %44 = arith.truncf %39 : vector<8x32xf32> to vector<8x32xbf16>
    %45 = vector.shape_cast %44 : vector<8x32xbf16> to vector<8x4x8xbf16>
    %46 = tpu.transpose %45, [1, 0, 2] : vector<8x4x8xbf16> -> vector<4x8x8xbf16>
    %47 = arith.truncf %40 : vector<8x32xf32> to vector<8x32xbf16>
    %48 = vector.shape_cast %47 : vector<8x32xbf16> to vector<8x4x8xbf16>
    %49 = tpu.transpose %48, [1, 0, 2] : vector<8x4x8xbf16> -> vector<4x8x8xbf16>
    "tpu.trace_start"() <{level = 10 : i32, message = "hqd,hkd->hqk"}> : () -> ()
    %cst_18 = arith.constant dense<0.000000e+00> : vector<4x8x8xf32>
    %50 = tpu.matmul %43, %46, %cst_18 {dimension_numbers = #tpu.dot_dimension_numbers<[2], [2], [1], [1], [0, 0, 0, 1, 1, 1], [0], [0]>} : vector<4x8x8xbf16>, vector<4x8x8xbf16>, vector<4x8x8xf32> -> vector<4x8x8xf32>
    "tpu.trace_stop"() : () -> ()
    %51 = tpu.iota {dimensions = array<i32: 0>} : vector<8x8xi32>
    %52 = tpu.iota {dimensions = array<i32: 1>} : vector<8x8xi32>
    %53 = arith.cmpi sle, %52, %51 : vector<8x8xi32>
    %54 = vector.shape_cast %53 : vector<8x8xi1> to vector<1x8x8xi1>
    %cst_19 = arith.constant -1.000000e+30 : f32
    %55 = vector.shape_cast %54 : vector<1x8x8xi1> to vector<1x8x8xi1>
    %56 = vector.broadcast %55 : vector<1x8x8xi1> to vector<4x8x8xi1>
    %57 = vector.broadcast %cst_19 : f32 to vector<4x8x8xf32>
    %58 = arith.select %56, %50, %57 : vector<4x8x8xi1>, vector<4x8x8xf32>
    %cst_20 = arith.constant dense<0xFF800000> : vector<4x8xf32>
    %59 = vector.multi_reduction <maximumf>, %58, %cst_20 [2] : vector<4x8x8xf32> to vector<4x8xf32>
    %60 = vector.shape_cast %59 : vector<4x8xf32> to vector<4x8x1xf32>
    %61 = vector.broadcast %60 : vector<4x8x1xf32> to vector<4x8x8xf32>
    %62 = arith.subf %58, %61 : vector<4x8x8xf32>
    %63 = math.exp %62 : vector<4x8x8xf32>
    %cst_21 = arith.constant dense<0.000000e+00> : vector<4x8xf32>
    %64 = vector.multi_reduction <add>, %63, %cst_21 [2] : vector<4x8x8xf32> to vector<4x8xf32>
    %65 = vector.shape_cast %64 : vector<4x8xf32> to vector<4x8x1xf32>
    %66 = vector.broadcast %65 : vector<4x8x1xf32> to vector<4x8x8xf32>
    %67 = arith.divf %63, %66 : vector<4x8x8xf32>
    %68 = arith.truncf %67 : vector<4x8x8xf32> to vector<4x8x8xbf16>
    "tpu.trace_start"() <{level = 10 : i32, message = "hqk,hkd->hqd"}> : () -> ()
    %cst_22 = arith.constant dense<0.000000e+00> : vector<4x8x8xf32>
    %69 = tpu.matmul %68, %49, %cst_22 {dimension_numbers = #tpu.dot_dimension_numbers<[2], [1], [1], [2], [0, 0, 0, 1, 1, 2], [0], [0]>} : vector<4x8x8xbf16>, vector<4x8x8xbf16>, vector<4x8x8xf32> -> vector<4x8x8xf32>
    "tpu.trace_stop"() : () -> ()
    %70 = tpu.transpose %69, [1, 0, 2] : vector<4x8x8xf32> -> vector<8x4x8xf32>
    %71 = vector.shape_cast %70 : vector<8x4x8xf32> to vector<8x32xf32>
    %72 = arith.truncf %71 : vector<8x32xf32> to vector<8x32xbf16>
    %c0_23 = arith.constant 0 : index
    %c0_24 = arith.constant 0 : index
    %c0_25 = arith.constant 0 : index
    %73 = vector.load %arg6[%c0_23, %c0_24, %c0_25] : memref<1x32x32xbf16, #tpu.memory_space<vmem>>, vector<1x32x32xbf16>
    %74 = vector.shape_cast %73 : vector<1x32x32xbf16> to vector<32x32xbf16>
    %cst_26 = arith.constant dense<0.000000e+00> : vector<8x32xf32>
    %75 = tpu.matmul %72, %74, %cst_26 {dimension_numbers = #tpu.dot_dimension_numbers<[1], [0], [0], [1], [0, 0, 1, 1], [], []>} : vector<8x32xbf16>, vector<32x32xbf16>, vector<8x32xf32> -> vector<8x32xf32>
    %c0_27 = arith.constant 0 : index
    %c0_28 = arith.constant 0 : index
    %c0_29 = arith.constant 0 : index
    %76 = vector.load %arg7[%c0_27, %c0_28, %c0_29] : memref<1x1x32xf32, #tpu.memory_space<vmem>>, vector<1x1x32xf32>
    %77 = vector.shape_cast %76 : vector<1x1x32xf32> to vector<1x32xf32>
    %78 = vector.broadcast %77 : vector<1x32xf32> to vector<8x32xf32>
    %79 = arith.addf %75, %78 : vector<8x32xf32>
    %80 = arith.addf %5, %79 : vector<8x32xf32>
    %c0_30 = arith.constant 0 : index
    %c0_31 = arith.constant 0 : index
    %c0_32 = arith.constant 0 : index
    %81 = vector.load %arg8[%c0_30, %c0_31, %c0_32] : memref<1x1x32xf32, #tpu.memory_space<vmem>>, vector<1x1x32xf32>
    %82 = vector.shape_cast %81 : vector<1x1x32xf32> to vector<1x32xf32>
    %c0_33 = arith.constant 0 : index
    %c0_34 = arith.constant 0 : index
    %c0_35 = arith.constant 0 : index
    %83 = vector.load %arg9[%c0_33, %c0_34, %c0_35] : memref<1x1x32xf32, #tpu.memory_space<vmem>>, vector<1x1x32xf32>
    %84 = vector.shape_cast %83 : vector<1x1x32xf32> to vector<1x32xf32>
    %cst_36 = arith.constant dense<0.000000e+00> : vector<8xf32>
    %85 = vector.multi_reduction <add>, %80, %cst_36 [1] : vector<8x32xf32> to vector<8xf32>
    %86 = vector.shape_cast %85 : vector<8xf32> to vector<8x1xf32>
    %cst_37 = arith.constant 3.200000e+01 : f32
    %87 = vector.broadcast %cst_37 : f32 to vector<8x1xf32>
    %88 = arith.divf %86, %87 : vector<8x1xf32>
    %89 = vector.broadcast %88 : vector<8x1xf32> to vector<8x32xf32>
    %90 = arith.subf %80, %89 : vector<8x32xf32>
    %91 = arith.mulf %90, %90 : vector<8x32xf32>
    %cst_38 = arith.constant dense<0.000000e+00> : vector<8xf32>
    %92 = vector.multi_reduction <add>, %91, %cst_38 [1] : vector<8x32xf32> to vector<8xf32>
    %93 = vector.shape_cast %92 : vector<8xf32> to vector<8x1xf32>
    %cst_39 = arith.constant 3.200000e+01 : f32
    %94 = vector.broadcast %cst_39 : f32 to vector<8x1xf32>
    %95 = arith.divf %93, %94 : vector<8x1xf32>
    %96 = vector.broadcast %88 : vector<8x1xf32> to vector<8x32xf32>
    %97 = arith.subf %80, %96 : vector<8x32xf32>
    %cst_40 = arith.constant 9.99999974E-6 : f32
    %98 = vector.broadcast %cst_40 : f32 to vector<8x1xf32>
    %99 = arith.addf %95, %98 : vector<8x1xf32>
    %100 = math.rsqrt %99 : vector<8x1xf32>
    %101 = vector.broadcast %100 : vector<8x1xf32> to vector<8x32xf32>
    %102 = arith.mulf %97, %101 : vector<8x32xf32>
    %103 = vector.broadcast %82 : vector<1x32xf32> to vector<8x32xf32>
    %104 = arith.mulf %102, %103 : vector<8x32xf32>
    %105 = vector.broadcast %84 : vector<1x32xf32> to vector<8x32xf32>
    %106 = arith.addf %104, %105 : vector<8x32xf32>
    %107 = arith.truncf %106 : vector<8x32xf32> to vector<8x32xbf16>
    %c0_41 = arith.constant 0 : index
    %c0_42 = arith.constant 0 : index
    %c0_43 = arith.constant 0 : index
    %108 = vector.load %arg10[%c0_41, %c0_42, %c0_43] : memref<1x32x128xbf16, #tpu.memory_space<vmem>>, vector<1x32x128xbf16>
    %109 = vector.shape_cast %108 : vector<1x32x128xbf16> to vector<32x128xbf16>
    %cst_44 = arith.constant dense<0.000000e+00> : vector<8x128xf32>
    %110 = tpu.matmul %107, %109, %cst_44 {dimension_numbers = #tpu.dot_dimension_numbers<[1], [0], [0], [1], [0, 0, 1, 1], [], []>} : vector<8x32xbf16>, vector<32x128xbf16>, vector<8x128xf32> -> vector<8x128xf32>
    %c0_45 = arith.constant 0 : index
    %c0_46 = arith.constant 0 : index
    %c0_47 = arith.constant 0 : index
    %111 = vector.load %arg11[%c0_45, %c0_46, %c0_47] : memref<1x1x128xf32, #tpu.memory_space<vmem>>, vector<1x1x128xf32>
    %112 = vector.shape_cast %111 : vector<1x1x128xf32> to vector<1x128xf32>
    %113 = vector.broadcast %112 : vector<1x128xf32> to vector<8x128xf32>
    %114 = arith.addf %110, %113 : vector<8x128xf32>
    %115 = arith.mulf %114, %114 : vector<8x128xf32>
    %116 = arith.mulf %114, %115 : vector<8x128xf32>
    %cst_48 = arith.constant 4.471500e-02 : f32
    %117 = vector.broadcast %cst_48 : f32 to vector<8x128xf32>
    %118 = arith.mulf %117, %116 : vector<8x128xf32>
    %119 = arith.addf %114, %118 : vector<8x128xf32>
    %cst_49 = arith.constant 0.797884583 : f32
    %120 = vector.broadcast %cst_49 : f32 to vector<8x128xf32>
    %121 = arith.mulf %120, %119 : vector<8x128xf32>
    %122 = math.tanh %121 : vector<8x128xf32>
    %cst_50 = arith.constant 1.000000e+00 : f32
    %123 = vector.broadcast %cst_50 : f32 to vector<8x128xf32>
    %124 = arith.addf %123, %122 : vector<8x128xf32>
    %cst_51 = arith.constant 5.000000e-01 : f32
    %125 = vector.broadcast %cst_51 : f32 to vector<8x128xf32>
    %126 = arith.mulf %125, %124 : vector<8x128xf32>
    %127 = arith.mulf %114, %126 : vector<8x128xf32>
    %128 = arith.truncf %127 : vector<8x128xf32> to vector<8x128xbf16>
    %c0_52 = arith.constant 0 : index
    %c0_53 = arith.constant 0 : index
    %c0_54 = arith.constant 0 : index
    %129 = vector.load %arg12[%c0_52, %c0_53, %c0_54] : memref<1x128x32xbf16, #tpu.memory_space<vmem>>, vector<1x128x32xbf16>
    %130 = vector.shape_cast %129 : vector<1x128x32xbf16> to vector<128x32xbf16>
    %cst_55 = arith.constant dense<0.000000e+00> : vector<8x32xf32>
    %131 = tpu.matmul %128, %130, %cst_55 {dimension_numbers = #tpu.dot_dimension_numbers<[1], [0], [0], [1], [0, 0, 1, 1], [], []>} : vector<8x128xbf16>, vector<128x32xbf16>, vector<8x32xf32> -> vector<8x32xf32>
    %c0_56 = arith.constant 0 : index
    %c0_57 = arith.constant 0 : index
    %c0_58 = arith.constant 0 : index
    %132 = vector.load %arg13[%c0_56, %c0_57, %c0_58] : memref<1x1x32xf32, #tpu.memory_space<vmem>>, vector<1x1x32xf32>
    %133 = vector.shape_cast %132 : vector<1x1x32xf32> to vector<1x32xf32>
    %134 = vector.broadcast %133 : vector<1x32xf32> to vector<8x32xf32>
    %135 = arith.addf %131, %134 : vector<8x32xf32>
    %136 = arith.addf %80, %135 : vector<8x32xf32>
    %137 = arith.truncf %136 : vector<8x32xf32> to vector<8x32xbf16>
    %c0_59 = arith.constant 0 : index
    %c0_60 = arith.constant 0 : index
    %c0_61 = arith.constant 0 : index
    %138 = vector.load %arg14[%c0_59, %c0_60, %c0_61] : memref<1x8x32xbf16, #tpu.memory_space<vmem>>, vector<1x8x32xbf16>
    %139 = vector.shape_cast %138 : vector<1x8x32xbf16> to vector<8x32xbf16>
    %140 = vector.shape_cast %137 : vector<8x32xbf16> to vector<1x8x32xbf16>
    tpu.vector_store %arg14[%c0_59, %c0_60, %c0_61], %140 {strides = array<i32>} : memref<1x8x32xbf16, #tpu.memory_space<vmem>>, vector<1x8x32xbf16>,
    return
  }
  func.func @transform_0(%arg0: i32, %arg1: i32) -> (i32, i32, i32) {
    %c0_i32 = arith.constant 0 : i32
    %c0_i32_0 = arith.constant 0 : i32
    %c0_i32_1 = arith.constant 0 : i32
    return %arg0, %c0_i32, %c0_i32_0 : i32, i32, i32
  }
  func.func @transform_1(%arg0: i32, %arg1: i32) -> (i32, i32, i32) {
    %c0_i32 = arith.constant 0 : i32
    %c0_i32_0 = arith.constant 0 : i32
    %c0_i32_1 = arith.constant 0 : i32
    return %arg1, %c0_i32, %c0_i32_0 : i32, i32, i32
  }
  func.func @transform_2(%arg0: i32, %arg1: i32) -> (i32, i32, i32) {
    %c0_i32 = arith.constant 0 : i32
    %c0_i32_0 = arith.constant 0 : i32
    %c0_i32_1 = arith.constant 0 : i32
    return %arg1, %c0_i32, %c0_i32_0 : i32, i32, i32
  }
  func.func @transform_3(%arg0: i32, %arg1: i32) -> (i32, i32, i32) {
    %c0_i32 = arith.constant 0 : i32
    %c0_i32_0 = arith.constant 0 : i32
    %c0_i32_1 = arith.constant 0 : i32
    return %arg1, %c0_i32, %c0_i32_0 : i32, i32, i32
  }
  func.func @transform_4(%arg0: i32, %arg1: i32) -> (i32, i32, i32) {
    %c0_i32 = arith.constant 0 : i32
    %c0_i32_0 = arith.constant 0 : i32
    %c0_i32_1 = arith.constant 0 : i32
    return %arg1, %c0_i32, %c0_i32_0 : i32, i32, i32
  }
  func.func @transform_5(%arg0: i32, %arg1: i32) -> (i32, i32, i32) {
    %c0_i32 = arith.constant 0 : i32
    %c0_i32_0 = arith.constant 0 : i32
    %c0_i32_1 = arith.constant 0 : i32
    return %arg1, %c0_i32, %c0_i32_0 : i32, i32, i32
  }
  func.func @transform_6(%arg0: i32, %arg1: i32) -> (i32, i32, i32) {
    %c0_i32 = arith.constant 0 : i32
    %c0_i32_0 = arith.constant 0 : i32
    %c0_i32_1 = arith.constant 0 : i32
    return %arg1, %c0_i32, %c0_i32_0 : i32, i32, i32
  }
  func.func @transform_7(%arg0: i32, %arg1: i32) -> (i32, i32, i32) {
    %c0_i32 = arith.constant 0 : i32
    %c0_i32_0 = arith.constant 0 : i32
    %c0_i32_1 = arith.constant 0 : i32
    return %arg1, %c0_i32, %c0_i32_0 : i32, i32, i32
  }
  func.func @transform_8(%arg0: i32, %arg1: i32) -> (i32, i32, i32) {
    %c0_i32 = arith.constant 0 : i32
    %c0_i32_0 = arith.constant 0 : i32
    %c0_i32_1 = arith.constant 0 : i32
    return %arg1, %c0_i32, %c0_i32_0 : i32, i32, i32
  }
  func.func @transform_9(%arg0: i32, %arg1: i32) -> (i32, i32, i32) {
    %c0_i32 = arith.constant 0 : i32
    %c0_i32_0 = arith.constant 0 : i32
    %c0_i32_1 = arith.constant 0 : i32
    return %arg1, %c0_i32, %c0_i32_0 : i32, i32, i32
  }
  func.func @transform_10(%arg0: i32, %arg1: i32) -> (i32, i32, i32) {
    %c0_i32 = arith.constant 0 : i32
    %c0_i32_0 = arith.constant 0 : i32
    %c0_i32_1 = arith.constant 0 : i32
    return %arg1, %c0_i32, %c0_i32_0 : i32, i32, i32
  }
  func.func @transform_11(%arg0: i32, %arg1: i32) -> (i32, i32, i32) {
    %c0_i32 = arith.constant 0 : i32
    %c0_i32_0 = arith.constant 0 : i32
    %c0_i32_1 = arith.constant 0 : i32
    return %arg1, %c0_i32, %c0_i32_0 : i32, i32, i32
  }
  func.func @transform_12(%arg0: i32, %arg1: i32) -> (i32, i32, i32) {
    %c0_i32 = arith.constant 0 : i32
    %c0_i32_0 = arith.constant 0 : i32
    %c0_i32_1 = arith.constant 0 : i32
    return %arg0, %c0_i32, %c0_i32_0 : i32, i32, i32
  }
}

</mosaic_0001>

<bundles_post_ra>
// kernel: gpt_forward.3
= control target key start
LH: loop header
LB: loop body
LE: loop exit
PB: predicated region body
PF: predicated region fallthrough
CT: control target
= control target key end

     0   :  { %10 = vsyncpa [#allocation4], 0  ;;  %s816_s0 = inlined_call_operand.vmem [shape: bf16[2,8,32], index: 0, kind: input, shape index: {}]   ;;  %s817_s1 = inlined_call_operand.vmem [shape: f32[1,32], index: 1, kind: input, shape index: {}]   ;;  %s818_s2 = inlined_call_operand.vmem [shape: f32[1,32], index: 2, kind: input, shape index: {}]   ;;  %s819_s3 = inlined_call_operand.vmem [shape: bf16[32,128], index: 3, kind: input, shape index: {}]   ;;  %s820_s4 = inlined_call_operand.vmem [shape: f32[1,128], index: 4, kind: input, shape index: {}]   ;;  %s821_s5 = inlined_call_operand.hbm [shape: f32[2,8,128], index: 5, kind: output, shape index: {}]  }
   0x1   :  { %12 = vsyncpa [#allocation4 + $0x1], 0  ;;  %s687_s18 = smov 0   ;;  %s689_s19 = smov 0  }
   0x2   :  { %s691_s20 = smov 0   ;;  %s693_s21 = smov 0  }
   0x3   :  { %s695_s22 = smov 0   ;;  %s697_s23 = smov 0  }
   0x4 LB: > { %s485_s24 = sadd.s32 4294967295, %s652_s23   ;;  %s486_s25 = sadd.s32 4294967294, %s652_s23   ;;  %s652_s23 = sphi %s697_s23, %s18_s23   ;;  %s648_s22 = sphi %s695_s22, %s828_s22   ;;  %s644_s21 = sphi %s693_s21, %s827_s21   ;;  %s640_s20 = sphi %s691_s20, %s826_s20   ;;  %s636_s19 = sphi %s689_s19, %s825_s19   ;;  %s632_s18 = sphi %s687_s18, %s824_s18  }
   0x5   : > { %s30_s26 = sadd.s32 1, %s648_s22  ;;  %s159_s27 = sadd.s32 1, %s640_s20 }
   0x6   : > { %p32_p0 = scmp.ge.s32.totalorder %s30_s26, 2  ;;  %p169_p1 = scmp.ne.s32.totalorder %s640_s20, %s636_s19 }
   0x7   : > { %p170_p2 = scmp.eq.s32.totalorder %s485_s24, 1  ;;  %p175_p3 = scmp.ne.s32.totalorder %s636_s19, %s632_s18 }
   0x8   : > { %s830_s26 = smov (%p32_p0, %s30_s26), 0  ;;  %p176_p5 = scmp.eq.s32.totalorder %s486_s25, 1 }
   0x9   : > { %p727_p4 = por %p170_p2, %p169_p1  ;;  %s154_s29 = ssub.s32 %s648_s22, %s830_s26 }
   0xa   : > { %p491_p6 = scmp.ge.s32.totalorder %s652_s23, 1  ;;  %p157_p7 = scmp.eq.s32.totalorder %s154_s29, 0 }
   0xb   : > { %p734_p8 = por %p176_p5, %p175_p3  ;;  %p220_p9 = scmp.lt.s32.totalorder %s652_s23, 3 }
   0xc   : > { %s740_s6 = scalar_select %p157_p7, %s640_s20, %s159_s27  }
   0xd   : > { %p221_p10 = pnand %p491_p6, %p220_p9 }
   0xe   : > { %p254_p11 = scmp.lt.s32.totalorder (!%p221_p10), %s644_s21, 1  ;;  %s251_s27 = sand.u32 (!%p221_p10), 1, %s636_s19  }
   0xf   : > { %224 = sbr.rel (%p221_p10) target bundleno = 554 (0x22a), region = 40  ;;  %s492_s29 = sshll.u32 (!%p221_p10), %s251_s27, 3 }
  0x10   : > { %s501_s9 = sshll.u32 (!%p221_p10), %s644_s21, 7  ;;  %s253_s10 = scalar_lea.vmem (!%p221_p10), [#allocation3], %s492_s29 }
  0x11   : > { %s770_s14 = scalar_lea.hbm (!%p221_p10), %s821_s5, %s501_s9  ;;  %s376_s15 = scalar_lea.sflag (!%p221_p10), [#allocation4], %s251_s27 }
  0x14   : > { %s255_s7 = scalar_select %p254_p11, %s644_s21, 1  ;;  %vm274_vm0 = vcmask 261120   ;;  %v572_v8 = vld [vmem:[%s819_s3 + $0x8] sm:$0xff]   ;;  %v654_v9 = vmov 0.0   ;;  %v573_v10 = vld [vmem:[%s819_s3] sm:$0xff]   ;;  %vm655_vm1 = vmmov 0  }
  0x15   : > { %507 = vmatprep.subr.bf16.mxu0 %v654_v9  ;;  %511 = vmatprep.mubr.msk.bf16.mxu0 %vm655_vm1, %v654_v9  ;;  %v494_v15 = vld [vmem:[%s817_s1] ss:$0 sm:$0xff]  ;;  %vm304_vm2 = vcmask 257024   ;;  %s656_s21 = smov [#allocation3]  }
  0x16   : > { %s493_s8 = sshll.u32 %s255_s7, 2  ;;  %508 = vmatpush3.bf16.msra.mxu0 %v572_v8  ;;  %v495_v17 = vld [vmem:[%s818_s2] ss:$0 sm:$0xff]  ;;  %s580_s17 = sshll.u32 %s656_s21, 4  ;;  %s581_s17 = int_to_ptr.vmem [resolvable:$false] %s580_s17 }
  0x17   : > { %s257_s11 = scalar_lea.vmem %s816_s0, %s493_s8  ;;  %509 = vmatprep.subr.bf16.mxu0 %v654_v9  ;;  %v496_v22 = vld [vmem:[%s820_s4] ss:$0 sm:$0xff]  ;;  %s582_s24 = scalar_lea.vmem %s581_s17, 256 }
  0x18   : > { %v270_v0 = vld [vmem:[%s257_s11] sm:$0xf]  ;;  %s390_s11 = sshll.u32 %s253_s10, 4  ;;  %s772_s11 = int_to_ptr.vmem [resolvable:$true] %s390_s11 }
  0x19   : > { %v271_v1 = vunpack.c.l.bf16 %v270_v0  ;;  %s576_s16 = scalar_lea.vmem %s772_s11, 128  ;;  %p583_p1 = scmp.lt.s32.totalorder %s772_s11, %s581_s17 }
  0x1a   : > { %510 = vmatpush3.bf16.msra.mxu0 %v573_v10  ;;  %p577_p12 = scmp.ne.s32.totalorder %s772_s11, %s576_s16  ;;  %p584_p2 = scmp.lt.s32.totalorder %s582_s24, %s576_s16 }
  0x1b   : > { %v275_v2 = vsel %vm274_vm0, %v271_v1, 0.0 }
  0x1c   : > { %276 = vadd.xlane.f32.xlu0 %v275_v2  ;;  %p578_p13 = pnand %p577_p12, %p727_p4  ;;  %p585_p3 = por %p584_p2, %p583_p1 }
  0x1e   : > { %p579_p0 = pneg %p578_p13 }
  0x20   : > { %p586_p5 = pnand %p585_p3, %p579_p0 }
  0xa5   : > { %v277_v3 = vpop.xlane.xlu0 %276 }
  0xa6   : > { %v279_v4 = vmul.f32 0.03125, %v277_v3 }
  0xa8   : > { %v280_v5 = vsub.f32 %v271_v1, %v279_v4 }
  0xaa   : > { %v281_v6 = vmul.f32 %v280_v5, %v280_v5 }
  0xac   : > { %v282_v7 = vsel %vm274_vm0, %v281_v6, 0.0 }
  0xad   : > { %283 = vadd.xlane.f32.xlu0 %v282_v7 }
 0x136   : > { %v284_v11 = vpop.xlane.xlu0 %283 }
 0x137   : > { %v285_v12 = vmul.f32 0.03125, %v284_v11 }
 0x139   : > { %v286_v13 = vadd.f32 1e-05, %v285_v12 }
 0x13b   : > { %574 = vrsqrt.f32 %v286_v13 }
 0x148   : > { %v575_v14 = vpop.eup %574 }
 0x149   : > { %v288_v16 = vmul.f32 %v575_v14, %v280_v5 }
 0x14b   : > { %v295_v18 = vmul.f32 %v494_v15, %v288_v16 }
 0x14d   : > { %v302_v19 = vadd.f32 %v495_v17, %v295_v18 }
 0x14f   : > { %v303_v20 = vpack.c.bf16 %v302_v19, %v302_v19 }
 0x151   : > { %305 = vst.msk [vmem:[#allocation2] sm:$0xf] %vm304_vm2, %v303_v20 }
 0x158   : > { %v306_v21 = vld [vmem:[#allocation2] sm:$0xf] }
 0x159   : > { %512 = vmatmul.mubr.msk.bf16.vlgmr.msra.gmra.mxu0 %vm274_vm0, %v306_v21 }
 0x219   : > { %v368_v23 = vpop.f32.mrf.mxu0 }
 0x21a   : > { %v369_v24 = vadd.f32 %v496_v22, %v368_v23 }
 0x21b   : > { %v513_v25 = vpop.f32.mrf.mxu0 }
 0x21c   : > { %374 = vst [vmem:[%s253_s10] sm:$0xff] %v369_v24 }
 0x21d   : > { %v371_v26 = vpop.f32.mrf.mxu0 }
 0x21e   : > { %589 = shalt.err (!%p586_p5)
}
 0x21f   : > { %s590_s25 = scalar_lea.hbm %s770_s14, 128  ;;  %s594_s7 = scalar_lea.hbm %s821_s5, 256 }
 0x220   : > { %p591_p6 = scmp.ne.s32.totalorder %s770_s14, %s590_s25  ;;  %p595_p10 = scmp.lt.s32.totalorder %s770_s14, %s821_s5 }
 0x221   : > { %p596_p11 = scmp.lt.s32.totalorder %s594_s7, %s590_s25 }
 0x222   : > { %p592_p7 = pnand %p591_p6, %p727_p4 }
 0x223   : > { %p597_p12 = por %p596_p11, %p595_p10 }
 0x224   : > { %p593_p9 = pneg %p592_p7 }
 0x226   : > { %p598_p13 = pnand %p597_p12, %p593_p9 }
 0x228   : > { %601 = shalt.err (!%p598_p13)
}
 0x229   : > { %515 = dma.vmem_to_hbm [thread:$0]  (%p727_p4), %s772_s11, 128, %s770_s14, %s376_s15   ;;  %v514_v27 = vpop.f32.mrf.mxu0 }
 0x22a PF: > { %p521_p0 = scmp.ge.s32.totalorder %s652_s23, 2  ;;  %s402_s10 = sand.u32 1, %s632_s18  }
 0x22b   : > { %s403_s12 = scalar_lea.sflag [#allocation4], %s402_s10 }
 0x22c   : > { %p518_p1 = pnand %p521_p0, %p734_p8 }
 0x22e   : > { %p519_p2 = pneg %p518_p1 }
 0x230   : > { %627 = dma.done.wait (%p519_p2), %s403_s12, 128  }
 0x231   : > { %629 = vsyncadd (%p519_p2), %s403_s12, 4294967168  ;;  %s18_s23 = sadd.s32 1, %s652_s23   ;;  %s824_s18 = smov %s636_s19 }
 0x232   : > { %p15_p3 = scmp.ge.s32.totalorder %s18_s23, 4   ;;  %s825_s19 = smov %s640_s20 }
 0x233   : > { %s826_s20 = smov %s740_s6  ;;  %s827_s21 = smov %s648_s22 }
 0x234   : > { %s828_s22 = smov %s830_s26  ;;  %17 = sbr.rel (!%p15_p3) target bundleno = 4 (0x4), region = 85 }
 0x239   :  { %408 = vsyncpa [#allocation4], 1 }
 0x23a   :  { %410 = vsyncpa [#allocation4 + $0x1], 1 }

// kernel: gpt_forward.2
= control target key start
LH: loop header
LB: loop body
LE: loop exit
PB: predicated region body
PF: predicated region fallthrough
CT: control target
= control target key end

     0   :  { %s2653_s21 = smov 0   ;;  %s2655_s22 = smov 0   ;;  %s3039_s0 = inlined_call_operand.vmem [shape: bf16[2,8,32], index: 0, kind: input, shape index: {}]   ;;  %s3040_s1 = inlined_call_operand.vmem [shape: f32[2,1,32], index: 1, kind: input, shape index: {}]   ;;  %s3041_s2 = inlined_call_operand.vmem [shape: f32[2,1,32], index: 2, kind: input, shape index: {}]   ;;  %s3042_s3 = inlined_call_operand.vmem [shape: bf16[2,32,96], index: 3, kind: input, shape index: {}]   ;;  %s3043_s4 = inlined_call_operand.vmem [shape: bf16[2,32,32], index: 4, kind: input, shape index: {}]   ;;  %s3044_s5 = inlined_call_operand.vmem [shape: f32[2,1,32], index: 5, kind: input, shape index: {}]   ;;  %s3045_s6 = inlined_call_operand.vmem [shape: f32[2,1,32], index: 6, kind: input, shape index: {}]   ;;  %s3046_s7 = inlined_call_operand.vmem [shape: f32[2,1,32], index: 7, kind: input, shape index: {}]   ;;  %s3047_s8 = inlined_call_operand.vmem [shape: bf16[2,32,128], index: 8, kind: input, shape index: {}]   ;;  %s3048_s9 = inlined_call_operand.vmem [shape: f32[2,1,128], index: 9, kind: input, shape index: {}]   ;;  %s3049_s10 = inlined_call_operand.vmem [shape: bf16[2,128,32], index: 10, kind: input, shape index: {}]   ;;  %s3050_s11 = inlined_call_operand.vmem [shape: f32[2,1,32], index: 11, kind: input, shape index: {}]   ;;  %s3051_s12 = inlined_call_operand.vmem [shape: bf16[2,8,32], index: 12, kind: output, shape index: {}]  }
   0x1   :  { %3057 = sst [smem:[#allocation9_spill]] %s3039_s0  ;;  %s2657_s23 = smov 0  }
   0x2   :  { %3058 = sst [smem:[#allocation10_spill]] %s3042_s3  ;;  %s2659_s24 = smov 0  }
   0x3   :  { %3059 = sst [smem:[#allocation11_spill]] %s3043_s4  ;;  %s2661_s25 = smov 0  }
   0x4 LB: > { %3060 = sst [smem:[#allocation2_spill]] %s2557_s21  ;;  %s31_s26 = sadd.s32 1, %s2565_s23  ;;  %s2573_s25 = sphi %s2661_s25, %s22_s25   ;;  %s2569_s24 = sphi %s2659_s24, %s3080_s24   ;;  %s2565_s23 = sphi %s2657_s23, %s3079_s23   ;;  %s2561_s22 = sphi %s2655_s22, %s3078_s22   ;;  %s2557_s21 = sphi %s2653_s21, %s3077_s21  }
   0x5   : > { %3061 = sst [smem:[#allocation3_spill]] %s2565_s23  ;;  %s34_s27 = sadd.s32 1, %s2569_s24 }
   0x6   : > { %3062 = sst [smem:[#allocation4_spill]] %s2569_s24  ;;  %p32_p0 = scmp.ge.s32.totalorder %s31_s26, 2 }
   0x7   : > { %3063 = sst [smem:[#allocation5_spill]] %s2573_s25  ;;  %p2268_p1 = scmp.ge.s32.totalorder %s2573_s25, 1 }
   0x8   : > { %p469_p2 = scmp.lt.s32.totalorder %s2573_s25, 5  ;;  %s3082_s26 = smov (%p32_p0, %s31_s26), 0 }
   0x9   : > { %3064 = sst [smem:[#allocation6_spill]] %s3082_s26  ;;  %s3084_s27 = smov (!%p32_p0, %s34_s27), %s2569_s24 }
   0xa   : > { %p470_p3 = pnand %p2268_p1, %p469_p2  ;;  %p36_p4 = scmp.ge.s32.totalorder %s3084_s27, 2 }
   0xc   : > { %s3086_s27 = smov (%p36_p4, %s3084_s27), 0  ;;  %473 = sbr.rel (%p470_p3) target bundleno = 2666 (0xa6a), region = 68 }
   0xd   : > { %3065 = sst [smem:[#allocation7_spill]] %s3086_s27 }
  0x11   : > { %p550_p5 = scmp.lt.s32.totalorder %s2561_s22, 1  ;;  %p554_p6 = scmp.lt.s32.totalorder %s2557_s21, 1 }
  0x12   : > { %s3066_s0 = sld [smem:[#allocation9_spill]] }
  0x13   : > { %s3088_s22 = smov (!%p550_p5, %s2561_s22), 1  ;;  %s3067_s3 = sld [smem:[#allocation10_spill]] }
  0x14   : > { %s2687_s28 = scalar_select %p554_p6, %s2557_s21, 1 }
  0x15   : > { %s2269_s29 = sshll.u32 %s3088_s22, 2  ;;  %s3068_s4 = sld [smem:[#allocation11_spill]] }
  0x16   : > { %s2316_s27 = sshll.u32 %s2687_s28, 4  ;;  %s575_s18 = scalar_lea.vmem %s3045_s6, %s2687_s28 }
  0x17   : > { %s594_s20 = scalar_lea.vmem %s3050_s11, %s2687_s28  ;;  %s2745_s24 = scalar_lea.vmem %s3051_s12, %s2269_s29 }
  0x18   : > { %s553_s14 = scalar_lea.vmem %s3066_s0, %s2269_s29 }
  0x19   : > { %s2704_s23 = scalar_lea.vmem %s3067_s3, %s2316_s27  ;;  %s2726_s3 = scalar_lea.vmem %s3047_s8, %s2316_s27 }
  0x1b   : > { %s2709_s21 = scalar_lea.vmem %s3068_s4, %s2316_s27  ;;  %s586_s4 = scalar_lea.vmem %s3048_s9, %s2687_s28 }
  0x1c   : > { %3069 = sst [smem:[#allocation8_spill]] %s2709_s21  ;;  %s2319_s21 = sshll.u32 %s2687_s28, 6 }
  0x1d   : > { %s2736_s15 = scalar_lea.vmem %s3049_s10, %s2319_s21  ;;  %s3070_s27 = sld [smem:[#allocation2_spill]] }
  0x23   : > { %p2279_p7 = scmp.ne.s32.totalorder %s3070_s27, 0 }
  0x25   : > { %603 = sbr.rel (%p2279_p7) target bundleno = 44 (0x2c), region = 72 }
  0x2a   : > { %v604_v0 = vld [vmem:[%s553_s14] sm:$0xf]  ;;  %vm605_vm0 = vcmask 257024  }
  0x2b   : > { %606 = vst.msk [vmem:[%s2745_s24] sm:$0xf] %vm605_vm0, %v604_v0 }
  0x2c PF: > { %vm611_vm1 = vcmask 261120   ;;  %v2499_v9 = vld [vmem:[%s2704_s23 + $0x8] sm:$0xff]   ;;  %v2575_v10 = vmov 0.0   ;;  %vm2576_vm2 = vmmov 0   ;;  %v2500_v11 = vld [vmem:[%s2704_s23] sm:$0xff]   ;;  %s3071_s29 = scalar_lea.vmem %s3040_s1, %s2687_s28  ;;  %s3072_s26 = scalar_lea.vmem %s3041_s2, %s2687_s28  ;;  %v712_v34 = vlaneseq }
  0x2d   : > { %2354 = vmatprep.subr.bf16.mxu0 %v2575_v10  ;;  %2358 = vmatprep.mubr.msk.bf16.mxu0 %vm2576_vm2, %v2575_v10  ;;  %v2280_v16 = vld [vmem:[%s3071_s29] ss:$0 sm:$0xff]  ;;  %s2577_s25 = smov 104   ;;  %s2578_s22 = smov 120   ;;  %v2581_v32 = vmov 1983009808  }
  0x2e   : > { %2355 = vmatpush3.bf16.msra.mxu0 %v2499_v9  ;;  %2374 = vmatprep.subr.bf16.mxu1 %v2575_v10  ;;  %v2281_v18 = vld [vmem:[%s3072_s26] ss:$0 sm:$0xff]  ;;  %s2579_s30 = smov 112   ;;  %s2580_s13 = smov 96   ;;  %v710_v33 = vunpack.c.l.s4 %v2581_v32  ;;  %v2582_v36 = vmov 1934713408  }
  0x2f   : > { %2356 = vmatprep.subr.bf16.mxu0 %v2575_v10  ;;  %2376 = vmatprep.mubr.msk.bf16.mxu1 %vm2576_vm2, %v2575_v10  ;;  %v727_v37 = vunpack.c.l.s4 %v2582_v36  ;;  %v2800_v39 = vshrl.u32 %v712_v34, 7  ;;  %v2583_v55 = vmov 0   ;;  %vm1218_vm3 = vcmask 64512   ;;  %s2584_s17 = smov 64   ;;  %s3073_s16 = sld [smem:[#allocation8_spill]] }
  0x30   : > { %v711_v38 = vunpack.c.0.s8 %v710_v33  ;;  %vm1465_vm5 = vcmask 1043456   ;;  %s2585_s19 = smov 16   ;;  %s2586_s27 = smov 8   ;;  %vm1796_vm6 = vcmask 130048   ;;  %vm1798_vm7 = vcmask 195584  }
  0x31   : > { %v728_v41 = vunpack.c.0.s8 %v727_v37  ;;  %s2587_s0 = smov 24   ;;  %s3074_s23 = scalar_lea.vmem %s3044_s5, %s2687_s28  ;;  %vm2087_vm8 = vcmask 257024  }
  0x32   : > { %v607_v1 = vld [vmem:[%s2745_s24] sm:$0xf]  ;;  %2357 = vmatpush3.bf16.msra.mxu0 %v2500_v11  ;;  %v2803_v42 = vsub.s32 %v711_v38, %v2800_v39 }
  0x33   : > { %v2750_v2 = vunpack.c.l.bf16 %v607_v1  ;;  %2362 = vmatprep.subr.bf16.mxu0 %v2575_v10  ;;  %v2807_v45 = vsub.s32 %v728_v41, %v2800_v39 }
  0x35   : > { %v612_v3 = vsel %vm611_vm1, %v2750_v2, 0.0 }
  0x36   : > { %613 = vadd.xlane.f32.xlu0 %v612_v3 }
  0xbf   : > { %v614_v4 = vpop.xlane.xlu0 %613 }
  0xc0   : > { %v616_v5 = vmul.f32 0.03125, %v614_v4 }
  0xc2   : > { %v617_v6 = vsub.f32 %v2750_v2, %v616_v5 }
  0xc4   : > { %v618_v7 = vmul.f32 %v617_v6, %v617_v6 }
  0xc6   : > { %v619_v8 = vsel %vm611_vm1, %v618_v7, 0.0 }
  0xc7   : > { %620 = vadd.xlane.f32.xlu0 %v619_v8 }
 0x150   : > { %v621_v12 = vpop.xlane.xlu0 %620 }
 0x151   : > { %v622_v13 = vmul.f32 0.03125, %v621_v12 }
 0x153   : > { %v623_v14 = vadd.f32 1e-05, %v622_v13 }
 0x155   : > { %2513 = vrsqrt.f32 %v623_v14 }
 0x162   : > { %v2514_v15 = vpop.eup %2513 }
 0x163   : > { %v625_v17 = vmul.f32 %v2514_v15, %v617_v6 }
 0x165   : > { %v632_v19 = vmul.f32 %v2280_v16, %v625_v17 }
 0x167   : > { %v639_v20 = vadd.f32 %v2281_v18, %v632_v19 }
 0x169   : > { %v640_v21 = vpack.c.bf16 %v639_v20, %v639_v20 }
 0x16b   : > { %2359 = vmatmul.mubr.msk.bf16.vlgmr.msra.gmra.mxu0 %vm611_vm1, %v640_v21 }
 0x16c   : > { %2364 = vmatprep.mubr.msk.bf16.mxu0 %vm2576_vm2, %v2575_v10 }
 0x22b   : > { %v694_v22 = vpop.f32.mrf.mxu0 }
 0x22c   : > { %v700_v23 = vmul.f32 0.35355338, %v694_v22  ;;  %v2779_v24 = vpack.c.bf16 %v694_v22, %v694_v22 }
 0x22d   : > { %v2360_v25 = vpop.f32.mrf.mxu0 }
 0x22e   : > { %876 = vrot.lane.b32.xlu0 %v2779_v24, %s2577_s25  ;;  %872 = vrot.lane.b32.xlu1 %v2779_v24, %s2578_s22  ;;  %v2783_v27 = vpack.c.bf16 %v700_v23, %v700_v23 }
 0x22f   : > { %v697_v26 = vpop.f32.mrf.mxu0 }
 0x230   : > { %v715_v36 = vrot.slane %v2783_v27, %v2803_v42 }
 0x231   : > { %v2361_v28 = vpop.f32.mrf.mxu0 }
 0x232   : > { %874 = vrot.lane.b32.xlu1 %v2779_v24, %s2579_s30  ;;  %707 = vrot.lane.b32.xlu0 %v2783_v27, %s2577_s25 }
 0x236   : > { %878 = vrot.lane.b32.xlu1 %v2779_v24, %s2580_s13 }
 0x2a0   : > { %v2788_v29 = vpop.permute.xlu1 %872  ;;  %v2794_v31 = vpop.permute.xlu0 %876 }
 0x2a1   : > { %880 = vrot.lane.b32.xlu1 %v2788_v29, %s2580_s13 }
 0x2a4   : > { %v2791_v30 = vpop.permute.xlu1 %874  ;;  %v708_v53 = vpop.permute.xlu0 %707 }
 0x2a5   : > { %882 = vrot.lane.b32.xlu1 %v2791_v30, %s2580_s13  ;;  %v757_v60 = vrot.slane %v708_v53, %v2803_v42 }
 0x2a8   : > { %v879_v35 = vpop.permute.xlu1 %878 }
 0x2a9   : > { %884 = vrot.lane.b32.xlu1 %v2794_v31, %s2580_s13  ;;  %v893_v44 = vrot.slane %v879_v35, %v2803_v42 }
 0x2ad   : > { %703 = vrot.lane.b32.xlu1 %v2783_v27, %s2578_s22 }
 0x2b1   : > { %705 = vrot.lane.b32.xlu1 %v2783_v27, %s2579_s30 }
 0x313   : > { %v881_v40 = vpop.permute.xlu1 %880 }
 0x314   : > { %v927_v54 = vrot.slane %v881_v40, %v2803_v42 }
 0x317   : > { %v883_v43 = vpop.permute.xlu1 %882 }
 0x318   : > { %v901_v46 = vrot.slane %v883_v43, %v2803_v42 }
 0x31a   : > { %v902_v47 = vcombine.low %v893_v44, %v901_v46  ;;  %v903_v48 = vcombine.high %v893_v44, %v901_v46 }
 0x31b   : > { %v885_v49 = vpop.permute.xlu1 %884 }
 0x31c   : > { %v910_v50 = vrot.slane %v902_v47, %v2807_v45  ;;  %v917_v51 = vrot.slane %v903_v48, %v2807_v45  ;;  %v935_v52 = vrot.slane %v885_v49, %v2803_v42 }
 0x31e   : > { %v918_v56 = vcombine.high %v910_v50, %v2583_v55  ;;  %v936_v57 = vcombine.low %v927_v54, %v935_v52  ;;  %v937_v58 = vcombine.high %v927_v54, %v935_v52  ;;  %v919_v61 = vcombine.high %v917_v51, %v2583_v55 }
 0x31f   : > { %v704_v59 = vpop.permute.xlu1 %703  ;;  %v958_v1 = vshrl.u32 %v910_v50, 16  ;;  %v974_v4 = vshrl.u32 %v917_v51, 16 }
 0x320   : > { %v749_v62 = vrot.slane %v704_v59, %v2803_v42  ;;  %v944_v63 = vrot.slane %v936_v57, %v2807_v45  ;;  %v951_v0 = vrot.slane %v937_v58, %v2807_v45  ;;  %v966_v3 = vshrl.u32 %v918_v56, 16 }
 0x321   : > { %v982_v11 = vshrl.u32 %v919_v61, 16 }
 0x322   : > { %v758_v5 = vcombine.low %v749_v62, %v757_v60  ;;  %v952_v6 = vcombine.high %v944_v63, %v2583_v55  ;;  %v953_v7 = vcombine.high %v951_v0, %v2583_v55  ;;  %v956_v8 = vpack.i.b16 %v944_v63, %v910_v50 }
 0x323   : > { %v959_v9 = vshrl.u32 %v944_v63, 16  ;;  %v972_v12 = vpack.i.b16 %v951_v0, %v917_v51  ;;  %v975_v13 = vshrl.u32 %v951_v0, 16  ;;  %v759_v14 = vcombine.high %v749_v62, %v757_v60  ;;  %v706_v23 = vpop.permute.xlu1 %705 }
 0x324   : > { %v964_v16 = vpack.i.b16 %v952_v6, %v918_v56  ;;  %v967_v17 = vshrl.u32 %v952_v6, 16  ;;  %v980_v18 = vpack.i.b16 %v953_v7, %v919_v61  ;;  %v983_v20 = vshrl.u32 %v953_v7, 16 }
 0x325   : > { %v960_v15 = vpack.i.b16 %v959_v9, %v958_v1  ;;  %v976_v19 = vpack.i.b16 %v975_v13, %v974_v4  ;;  %v986_v21 = vcombine.low %v956_v8, %v972_v12  ;;  %v766_v22 = vrot.slane %v758_v5, %v2807_v45 }
 0x326   : > { %v968_v25 = vpack.i.b16 %v967_v17, %v966_v3  ;;  %v994_v26 = vcombine.low %v964_v16, %v980_v18  ;;  %v984_v28 = vpack.i.b16 %v983_v20, %v982_v11  ;;  %v773_v33 = vrot.slane %v759_v14, %v2807_v45 }
 0x327   : > { %v1011_v32 = vcombine.low %v960_v15, %v976_v19  ;;  %v993_v35 = vrot.slane %v986_v21, %v2803_v42  ;;  %v723_v37 = vrot.slane %v706_v23, %v2803_v42  ;;  %v774_v41 = vcombine.high %v766_v22, %v2583_v55 }
 0x328   : > { %v1001_v38 = vrot.slane %v994_v26, %v2803_v42  ;;  %v1019_v40 = vcombine.low %v968_v25, %v984_v28  ;;  %v775_v47 = vcombine.high %v773_v33, %v2583_v55  ;;  %v781_v50 = vshrl.u32 %v766_v22, 16 }
 0x329   : > { %v724_v43 = vcombine.low %v715_v36, %v723_v37  ;;  %v725_v44 = vcombine.high %v715_v36, %v723_v37  ;;  %v1018_v48 = vrot.slane %v1011_v32, %v2803_v42  ;;  %v789_v52 = vshrl.u32 %v774_v41, 16 }
 0x32a   : > { %v1002_v46 = vcombine.low %v993_v35, %v1001_v38  ;;  %v1026_v49 = vrot.slane %v1019_v40, %v2803_v42  ;;  %v797_v53 = vshrl.u32 %v773_v33, 16  ;;  %v805_v61 = vshrl.u32 %v775_v47, 16 }
 0x32b   : > { %v732_v51 = vrot.slane %v724_v43, %v2807_v45  ;;  %v739_v27 = vrot.slane %v725_v44, %v2807_v45 }
 0x32c   : > { %v1009_v54 = vrot.slane %v1002_v46, %v2807_v45  ;;  %v1027_v56 = vcombine.low %v1018_v48, %v1026_v49 }
 0x32d   : > { %v740_v57 = vcombine.high %v732_v51, %v2583_v55  ;;  %v741_v58 = vcombine.high %v739_v27, %v2583_v55  ;;  %v778_v59 = vpack.i.b16 %v766_v22, %v732_v51  ;;  %v780_v60 = vshrl.u32 %v732_v51, 16 }
 0x32e   : > { %v794_v62 = vpack.i.b16 %v773_v33, %v739_v27  ;;  %v796_v63 = vshrl.u32 %v739_v27, 16  ;;  %v1034_v0 = vrot.slane %v1027_v56, %v2807_v45  ;;  %v1010_v13 = vcombine.high %v1009_v54, %v2583_v55 }
 0x32f   : > { %v782_v1 = vpack.i.b16 %v781_v50, %v780_v60  ;;  %v786_v3 = vpack.i.b16 %v774_v41, %v740_v57  ;;  %v788_v4 = vshrl.u32 %v740_v57, 16  ;;  %v802_v5 = vpack.i.b16 %v775_v47, %v741_v58 }
 0x330   : > { %v798_v6 = vpack.i.b16 %v797_v53, %v796_v63  ;;  %v804_v7 = vshrl.u32 %v741_v58, 16  ;;  %v808_v8 = vcombine.low %v778_v59, %v794_v62  ;;  %v1038_v9 = vpack.i.b16 %v1034_v0, %v1009_v54 }
 0x331   : > { %v790_v11 = vpack.i.b16 %v789_v52, %v788_v4  ;;  %v816_v12 = vcombine.low %v786_v3, %v802_v5  ;;  %v1035_v14 = vcombine.high %v1034_v0, %v2583_v55  ;;  %v1040_v28 = vshrl.u32 %v1034_v0, 16 }
 0x332   : > { %v806_v15 = vpack.i.b16 %v805_v61, %v804_v7  ;;  %v833_v16 = vcombine.low %v782_v1, %v798_v6  ;;  %v1223_v17 = vsel %vm1218_vm3, %v1038_v9, 0  ;;  %v815_v18 = vrot.slane %v808_v8, %v2803_v42 }
 0x333   : > { %v823_v19 = vrot.slane %v816_v12, %v2803_v42  ;;  %2363 = vmatpush3.bf16.xpose.msra.mxu0 %v1223_v17  ;;  %v1044_v20 = vpack.i.b16 %v1035_v14, %v1010_v13  ;;  %v1039_v35 = vshrl.u32 %v1009_v54, 16  ;;  %v1046_v43 = vshrl.u32 %v1035_v14, 16 }
 0x334   : > { %v841_v21 = vcombine.low %v790_v11, %v806_v15  ;;  %2368 = vmatprep.subr.bf16.mxu0 %v2575_v10  ;;  %v840_v25 = vrot.slane %v833_v16, %v2803_v42  ;;  %v1045_v47 = vshrl.u32 %v1010_v13, 16  ;;  %v1406_v56 = vand.u32 127, %v712_v34 }
 0x335   : > { %v824_v22 = vcombine.low %v815_v18, %v823_v19  ;;  %v1315_v23 = vsel %vm1218_vm3, %v1044_v20, 0  ;;  %v1041_v37 = vpack.i.b16 %v1040_v28, %v1039_v35 }
 0x336   : > { %v848_v26 = vrot.slane %v841_v21, %v2803_v42  ;;  %2375 = vmatpush3.bf16.xpose.msra.mxu1 %v1315_v23  ;;  %v1047_v50 = vpack.i.b16 %v1046_v43, %v1045_v47  ;;  %vm1407_vm4 = vcmp.le.s32.totalorder %v1406_v56, %v2800_v39 }
 0x337   : > { %2386 = vmatprep.subr.bf16.mxu1 %v2575_v10  ;;  %v831_v33 = vrot.slane %v824_v22, %v2807_v45  ;;  %v1269_v44 = vsel %vm1218_vm3, %v1041_v37, 0 }
 0x338   : > { %v849_v32 = vcombine.low %v840_v25, %v848_v26  ;;  %v1361_v27 = vsel %vm1218_vm3, %v1047_v50, 0 }
 0x339   : > { %v832_v40 = vcombine.high %v831_v33, %v2583_v55  ;;  %v861_v49 = vshrl.u32 %v831_v33, 16 }
 0x33a   : > { %v856_v36 = vrot.slane %v849_v32, %v2807_v45 }
 0x33b   : > { %v867_v53 = vshrl.u32 %v832_v40, 16 }
 0x33c   : > { %v860_v38 = vpack.i.b16 %v856_v36, %v831_v33  ;;  %v857_v41 = vcombine.high %v856_v36, %v2583_v55  ;;  %v862_v48 = vshrl.u32 %v856_v36, 16 }
 0x33e   : > { %2365 = vmatmul.mubr.msk.bf16.vlgmr.msra.gmra.mxu0 %vm1218_vm3, %v860_v38  ;;  %v866_v46 = vpack.i.b16 %v857_v41, %v832_v40  ;;  %v863_v51 = vpack.i.b16 %v862_v48, %v861_v49  ;;  %v868_v52 = vshrl.u32 %v857_v41, 16 }
 0x33f   : > { %2369 = vmatpush3.bf16.xpose.msra.mxu0 %v1269_v44  ;;  %2370 = vmatprep.mubr.msk.bf16.mxu0 %vm2576_vm2, %v2575_v10 }
 0x340   : > { %2377 = vmatmul.mubr.msk.bf16.vlgmr.msra.gmra.mxu1 %vm1218_vm3, %v866_v46  ;;  %2380 = vmatprep.subr.bf16.mxu0 %v2575_v10  ;;  %v869_v54 = vpack.i.b16 %v868_v52, %v867_v53 }
 0x341   : > { %2388 = vmatprep.mubr.msk.bf16.mxu1 %vm2576_vm2, %v2575_v10 }
 0x346   : > { %2371 = vmatmul.mubr.msk.bf16.vlgmr.msra.gmra.mxu0 %vm1218_vm3, %v863_v51 }
 0x347   : > { %2381 = vmatpush3.bf16.xpose.msra.mxu0 %v1361_v27  ;;  %2382 = vmatprep.mubr.msk.bf16.mxu0 %vm2576_vm2, %v2575_v10 }
 0x348   : > { %2392 = vmatprep.subr.bf16.mxu0 %v2575_v10 }
 0x34e   : > { %2383 = vmatmul.mubr.msk.bf16.vlgmr.msra.gmra.mxu0 %vm1218_vm3, %v869_v54 }
 0x34f   : > { %2394 = vmatprep.mubr.msk.bf16.mxu0 %vm2576_vm2, %v2575_v10 }
 0x3fe   : > { %v1259_v57 = vpop.f32.mrf.mxu0 }
 0x3ff   : > { %v1410_v58 = vsel %vm1407_vm4, %v1259_v57, -1e+30 }
 0x400   : > { %v2366_v59 = vpop.f32.mrf.mxu0  ;;  %v1351_v60 = vpop.f32.mrf.mxu1  ;;  %v1414_v61 = vsel %vm1218_vm3, %v1410_v58, -inf }
 0x401   : > { %v1412_v62 = vsel %vm1407_vm4, %v1351_v60, -1e+30  ;;  %1415 = vmax.xlane.f32.xlu1 %v1414_v61 }
 0x402   : > { %v1262_v63 = vpop.f32.mrf.mxu0  ;;  %v2378_v0 = vpop.f32.mrf.mxu1  ;;  %v1420_v1 = vsel %vm1218_vm3, %v1412_v62, -inf }
 0x403   : > { %1421 = vmax.xlane.f32.xlu0 %v1420_v1 }
 0x404   : > { %v2367_v34 = vpop.f32.mrf.mxu0  ;;  %v1354_v3 = vpop.f32.mrf.mxu1 }
 0x406   : > { %v1305_v4 = vpop.f32.mrf.mxu0  ;;  %v2379_v5 = vpop.f32.mrf.mxu1 }
 0x407   : > { %v1411_v6 = vsel %vm1407_vm4, %v1305_v4, -1e+30 }
 0x408   : > { %v2372_v7 = vpop.f32.mrf.mxu0  ;;  %v1417_v8 = vsel %vm1218_vm3, %v1411_v6, -inf }
 0x409   : > { %1418 = vmax.xlane.f32.xlu0 %v1417_v8 }
 0x40a   : > { %v1308_v9 = vpop.f32.mrf.mxu0 }
 0x40c   : > { %v2373_v11 = vpop.f32.mrf.mxu0 }
 0x40e   : > { %v1397_v12 = vpop.f32.mrf.mxu0 }
 0x40f   : > { %v1413_v13 = vsel %vm1407_vm4, %v1397_v12, -1e+30 }
 0x410   : > { %v2384_v14 = vpop.f32.mrf.mxu0  ;;  %v1423_v15 = vsel %vm1218_vm3, %v1413_v13, -inf }
 0x411   : > { %1424 = vmax.xlane.f32.xlu1 %v1423_v15 }
 0x412   : > { %v1400_v16 = vpop.f32.mrf.mxu0 }
 0x414   : > { %v2385_v17 = vpop.f32.mrf.mxu0 }
 0x41f   : > { %1048 = vrot.lane.b32.xlu0 %v2779_v24, %s2584_s17 }
 0x422   : > { %1050 = vrot.lane.b32.xlu1 %v2788_v29, %s2584_s17 }
 0x48a   : > { %v1416_v18 = vpop.xlane.xlu1 %1415 }
 0x48b   : > { %v1426_v19 = vsub.f32 %v1410_v58, %v1416_v18 }
 0x48c   : > { %v1422_v21 = vpop.xlane.xlu0 %1421 }
 0x48d   : > { %v1430_v20 = vmul.f32 1.442695, %v1426_v19  ;;  %v1428_v35 = vsub.f32 %v1412_v62, %v1422_v21 }
 0x48f   : > { %2515 = vpow2.f32 %v1430_v20  ;;  %v1434_v36 = vmul.f32 1.442695, %v1428_v35 }
 0x492   : > { %v1419_v22 = vpop.xlane.xlu0 %1418 }
 0x493   : > { %v1427_v23 = vsub.f32 %v1411_v6, %v1419_v22 }
 0x495   : > { %v1432_v39 = vmul.f32 1.442695, %v1427_v23 }
 0x496   : > { %v1049_v41 = vpop.permute.xlu0 %1048 }
 0x497   : > { %2517 = vpow2.f32 %v1432_v39  ;;  %v1063_v52 = vrot.slane %v1049_v41, %v2803_v42 }
 0x49a   : > { %v1425_v29 = vpop.xlane.xlu1 %1424 }
 0x49b   : > { %v1429_v32 = vsub.f32 %v1413_v13, %v1425_v29 }
 0x49c   : > { %v2885_v25 = vpop.eup %2515 }
 0x49d   : > { %v1438_v26 = vsel %vm1218_vm3, %v2885_v25, 0.0  ;;  %v1436_v33 = vmul.f32 1.442695, %v1429_v32 }
 0x49e   : > { %1439 = vadd.xlane.f32.xlu0 %v1438_v26  ;;  %v1051_v43 = vpop.permute.xlu1 %1050 }
 0x49f   : > { %2519 = vpow2.f32 %v1436_v33  ;;  %v1097_v47 = vrot.slane %v1051_v43, %v2803_v42 }
 0x4a0   : > { %2521 = vpow2.f32 %v1434_v36 }
 0x4a4   : > { %v2889_v28 = vpop.eup %2517 }
 0x4a5   : > { %v1441_v24 = vsel %vm1218_vm3, %v2889_v28, 0.0 }
 0x4a6   : > { %1442 = vadd.xlane.f32.xlu1 %v1441_v24 }
 0x4ac   : > { %v2895_v37 = vpop.eup %2519 }
 0x4ad   : > { %v1447_v38 = vsel %vm1218_vm3, %v2895_v37, 0.0  ;;  %v2899_v40 = vpop.eup %2521 }
 0x4b4   : > { %1054 = vrot.lane.b32.xlu0 %v2794_v31, %s2584_s17  ;;  %v1444_v31 = vsel %vm1218_vm3, %v2899_v40, 0.0 }
 0x4b7   : > { %1052 = vrot.lane.b32.xlu1 %v2791_v30, %s2584_s17 }
 0x4d3   : > { %1448 = vadd.xlane.f32.xlu0 %v1447_v38 }
 0x4db   : > { %1445 = vadd.xlane.f32.xlu1 %v1444_v31 }
 0x527   : > { %v1440_v30 = vpop.xlane.xlu0 %1439 }
 0x528   : > { %2523 = vrcp.f32 %v1440_v30 }
 0x52b   : > { %v1055_v44 = vpop.permute.xlu0 %1054 }
 0x52c   : > { %v1105_v46 = vrot.slane %v1055_v44, %v2803_v42 }
 0x52e   : > { %v1106_v48 = vcombine.low %v1097_v47, %v1105_v46  ;;  %v1107_v50 = vcombine.high %v1097_v47, %v1105_v46 }
 0x52f   : > { %v1443_v49 = vpop.xlane.xlu1 %1442 }
 0x530   : > { %v1114_v51 = vrot.slane %v1106_v48, %v2807_v45  ;;  %v1121_v54 = vrot.slane %v1107_v50, %v2807_v45  ;;  %2525 = vrcp.f32 %v1443_v49 }
 0x532   : > { %v1122_v58 = vcombine.high %v1114_v51, %v2583_v55  ;;  %v1123_v61 = vcombine.high %v1121_v54, %v2583_v55  ;;  %v1129_v62 = vshrl.u32 %v1114_v51, 16  ;;  %v1145_v4 = vshrl.u32 %v1121_v54, 16 }
 0x533   : > { %v1053_v27 = vpop.permute.xlu1 %1052 }
 0x534   : > { %v1071_v53 = vrot.slane %v1053_v27, %v2803_v42  ;;  %v1137_v3 = vshrl.u32 %v1122_v58, 16  ;;  %v1153_v12 = vshrl.u32 %v1123_v61, 16 }
 0x535   : > { %v2524_v29 = vpop.eup %2523 }
 0x536   : > { %v1072_v56 = vcombine.low %v1063_v52, %v1071_v53  ;;  %v1073_v57 = vcombine.high %v1063_v52, %v1071_v53  ;;  %v1451_v38 = vmul.f32 %v2524_v29, %v2885_v25 }
 0x538   : > { %v1080_v59 = vrot.slane %v1072_v56, %v2807_v45  ;;  %v1087_v60 = vrot.slane %v1073_v57, %v2807_v45  ;;  %v1458_v27 = vpack.c.bf16 %v1451_v38, %v1451_v38 }
 0x53a   : > { %v1088_v63 = vcombine.high %v1080_v59, %v2583_v55  ;;  %v1089_v0 = vcombine.high %v1087_v60, %v2583_v55  ;;  %v1126_v1 = vpack.i.b16 %v1114_v51, %v1080_v59  ;;  %v1128_v34 = vshrl.u32 %v1080_v59, 16 }
 0x53b   : > { %v1142_v5 = vpack.i.b16 %v1121_v54, %v1087_v60  ;;  %v1144_v6 = vshrl.u32 %v1087_v60, 16 }
 0x53c   : > { %v1130_v7 = vpack.i.b16 %v1129_v62, %v1128_v34  ;;  %v1134_v8 = vpack.i.b16 %v1122_v58, %v1088_v63  ;;  %v1136_v9 = vshrl.u32 %v1088_v63, 16  ;;  %v1150_v11 = vpack.i.b16 %v1123_v61, %v1089_v0 }
 0x53d   : > { %v1146_v13 = vpack.i.b16 %v1145_v4, %v1144_v6  ;;  %v1152_v14 = vshrl.u32 %v1089_v0, 16  ;;  %v1156_v15 = vcombine.low %v1126_v1, %v1142_v5  ;;  %v2526_v33 = vpop.eup %2525 }
 0x53e   : > { %v1138_v16 = vpack.i.b16 %v1137_v3, %v1136_v9  ;;  %v1164_v17 = vcombine.low %v1134_v8, %v1150_v11  ;;  %v1453_v44 = vmul.f32 %v2526_v33, %v2889_v28 }
 0x53f   : > { %v1154_v18 = vpack.i.b16 %v1153_v12, %v1152_v14  ;;  %v1181_v19 = vcombine.low %v1130_v7, %v1146_v13  ;;  %v1163_v20 = vrot.slane %v1156_v15, %v2803_v42 }
 0x540   : > { %v1171_v21 = vrot.slane %v1164_v17, %v2803_v42  ;;  %v1459_v52 = vpack.c.bf16 %v1453_v44, %v1453_v44 }
 0x541   : > { %v1189_v22 = vcombine.low %v1138_v16, %v1154_v18  ;;  %v1188_v39 = vrot.slane %v1181_v19, %v2803_v42 }
 0x542   : > { %v1172_v23 = vcombine.low %v1163_v20, %v1171_v21 }
 0x543   : > { %v1196_v26 = vrot.slane %v1189_v22, %v2803_v42 }
 0x544   : > { %v1179_v24 = vrot.slane %v1172_v23, %v2807_v45 }
 0x545   : > { %v1197_v32 = vcombine.low %v1188_v39, %v1196_v26  ;;  %v2501_v39 = vld [vmem:[%s3073_s16 + $0x8] sm:$0xff]  }
 0x546   : > { %v1180_v35 = vcombine.high %v1179_v24, %v2583_v55  ;;  %v1209_v41 = vshrl.u32 %v1179_v24, 16 }
 0x547   : > { %v1204_v36 = vrot.slane %v1197_v32, %v2807_v45 }
 0x548   : > { %v1215_v46 = vshrl.u32 %v1180_v35, 16 }
 0x549   : > { %v1208_v31 = vpack.i.b16 %v1204_v36, %v1179_v24  ;;  %v1210_v30 = vshrl.u32 %v1204_v36, 16  ;;  %v1205_v43 = vcombine.high %v1204_v36, %v2583_v55 }
 0x54b   : > { %v1467_v47 = vsel %vm1465_vm5, %v1208_v31, 0  ;;  %v1211_v48 = vpack.i.b16 %v1210_v30, %v1209_v41  ;;  %v1214_v49 = vpack.i.b16 %v1205_v43, %v1180_v35  ;;  %v1216_v50 = vshrl.u32 %v1205_v43, 16  ;;  %v2502_v41 = vld [vmem:[%s3073_s16] sm:$0xff]  }
 0x54c   : > { %2387 = vmatpush3.bf16.msra.mxu1 %v1467_v47 }
 0x54d   : > { %v1513_v51 = vsel %vm1465_vm5, %v1211_v48, 0  ;;  %2398 = vmatprep.subr.bf16.mxu1 %v2575_v10  ;;  %v1217_v25 = vpack.i.b16 %v1216_v50, %v1215_v46  ;;  %v1559_v55 = vsel %vm1465_vm5, %v1214_v49, 0 }
 0x54e   : > { %2393 = vmatpush3.bf16.msra.mxu0 %v1513_v51 }
 0x54f   : > { %2389 = vmatmul.mubr.msk.bf16.vlgmr.msra.gmra.mxu1 %vm1218_vm3, %v1458_v27  ;;  %2404 = vmatprep.subr.bf16.mxu0 %v2575_v10  ;;  %v1605_v28 = vsel %vm1465_vm5, %v1217_v25, 0 }
 0x550   : > { %2399 = vmatpush3.bf16.msra.mxu1 %v1559_v55  ;;  %2400 = vmatprep.mubr.msk.bf16.mxu1 %vm2576_vm2, %v2575_v10 }
 0x551   : > { %2395 = vmatmul.mubr.msk.bf16.vlgmr.msra.gmra.mxu0 %vm1218_vm3, %v1459_v52  ;;  %2410 = vmatprep.subr.bf16.mxu1 %v2575_v10 }
 0x552   : > { %2405 = vmatpush3.bf16.msra.mxu0 %v1605_v28  ;;  %2406 = vmatprep.mubr.msk.bf16.mxu0 %vm2576_vm2, %v2575_v10 }
 0x553   : > { %2418 = vmatprep.subr.bf16.mxu0 %v2575_v10 }
 0x55c   : > { %v1449_v53 = vpop.xlane.xlu0 %1448 }
 0x55d   : > { %2527 = vrcp.f32 %v1449_v53 }
 0x564   : > { %v1446_v54 = vpop.xlane.xlu1 %1445 }
 0x565   : > { %2529 = vrcp.f32 %v1446_v54 }
 0x56a   : > { %v2528_v56 = vpop.eup %2527 }
 0x56b   : > { %v1457_v57 = vmul.f32 %v2528_v56, %v2895_v37 }
 0x56d   : > { %v1461_v58 = vpack.c.bf16 %v1457_v57, %v1457_v57 }
 0x56f   : > { %2407 = vmatmul.mubr.msk.bf16.vlgmr.msra.gmra.mxu0 %vm1218_vm3, %v1461_v58 }
 0x570   : > { %2422 = vmatprep.mubr.msk.bf16.mxu0 %vm2576_vm2, %v2575_v10 }
 0x572   : > { %v2530_v59 = vpop.eup %2529 }
 0x573   : > { %v1455_v60 = vmul.f32 %v2530_v59, %v2899_v40 }
 0x575   : > { %v1460_v61 = vpack.c.bf16 %v1455_v60, %v1455_v60 }
 0x577   : > { %2401 = vmatmul.mubr.msk.bf16.vlgmr.msra.gmra.mxu1 %vm1218_vm3, %v1460_v61  ;;  %v2295_v61 = vld [vmem:[%s3074_s23] ss:$0 sm:$0xff] }
 0x578   : > { %2414 = vmatprep.mubr.msk.bf16.mxu1 %vm2576_vm2, %v2575_v10  ;;  %2411 = vmatpush3.bf16.msra.mxu1 %v2501_v39  ;;  %v2509_v39 = vld [vmem:[%s2736_s15 + $0x18] sm:$0xff]  }
 0x579   : > { %2412 = vmatprep.subr.bf16.mxu1 %v2575_v10 }
 0x57c   : > { %2413 = vmatpush3.bf16.msra.mxu1 %v2502_v41 }
 0x57d   : > { %2426 = vmatprep.subr.bf16.mxu1 %v2575_v10 }
 0x60f   : > { %v1503_v62 = vpop.f32.mrf.mxu1 }
 0x611   : > { %v2390_v63 = vpop.f32.mrf.mxu1  ;;  %v1549_v0 = vpop.f32.mrf.mxu0 }
 0x613   : > { %v1506_v1 = vpop.f32.mrf.mxu1  ;;  %v2396_v37 = vpop.f32.mrf.mxu0 }
 0x615   : > { %v2391_v34 = vpop.f32.mrf.mxu1  ;;  %v1552_v3 = vpop.f32.mrf.mxu0 }
 0x617   : > { %v2397_v4 = vpop.f32.mrf.mxu0 }
 0x62f   : > { %v1641_v5 = vpop.f32.mrf.mxu0 }
 0x630   : > { %v1663_v40 = vcombine.low %v1549_v0, %v1641_v5  ;;  %v1664_v9 = vcombine.high %v1549_v0, %v1641_v5 }
 0x631   : > { %v2408_v6 = vpop.f32.mrf.mxu0 }
 0x632   : > { %v1671_v15 = vrot.slane %v1663_v40, %v2803_v42  ;;  %v1678_v16 = vrot.slane %v1664_v9, %v2803_v42  ;;  %v2503_v40 = vld [vmem:[%s2726_s3 + $0x8] sm:$0xff]  }
 0x633   : > { %v1644_v7 = vpop.f32.mrf.mxu0  ;;  %2419 = vmatpush3.bf16.msra.mxu0 %v2503_v40 }
 0x634   : > { %2420 = vmatprep.subr.bf16.mxu0 %v2575_v10 }
 0x635   : > { %v2409_v8 = vpop.f32.mrf.mxu0 }
 0x637   : > { %v1595_v11 = vpop.f32.mrf.mxu1 }
 0x638   : > { %v1647_v12 = vcombine.low %v1503_v62, %v1595_v11  ;;  %v1648_v13 = vcombine.high %v1503_v62, %v1595_v11 }
 0x639   : > { %v2402_v14 = vpop.f32.mrf.mxu1 }
 0x63a   : > { %v1655_v17 = vrot.slane %v1647_v12, %v2803_v42  ;;  %v1662_v18 = vrot.slane %v1648_v13, %v2803_v42  ;;  %v2299_v14 = vld [vmem:[%s575_s18] ss:$0 sm:$0xff] }
 0x63b   : > { %v1598_v19 = vpop.f32.mrf.mxu1 }
 0x63c   : > { %v1679_v20 = vcombine.low %v1655_v17, %v1671_v15  ;;  %v1680_v21 = vcombine.high %v1655_v17, %v1671_v15  ;;  %v1695_v22 = vcombine.low %v1662_v18, %v1678_v16  ;;  %v1696_v23 = vcombine.high %v1662_v18, %v1678_v16 }
 0x63d   : > { %v2403_v26 = vpop.f32.mrf.mxu1 }
 0x63e   : > { %v1687_v24 = vrot.slane %v1679_v20, %v2807_v45  ;;  %v1694_v29 = vrot.slane %v1680_v21, %v2807_v45  ;;  %v1703_v32 = vrot.slane %v1695_v22, %v2807_v45  ;;  %v1710_v33 = vrot.slane %v1696_v23, %v2807_v45  ;;  %v2505_v20 = vld [vmem:[%s2736_s15 + $0x38] sm:$0xff]   ;;  %v2506_v21 = vld [vmem:[%s2736_s15 + $0x30] sm:$0xff]   ;;  %v2507_v22 = vld [vmem:[%s2736_s15 + $0x28] sm:$0xff]  }
 0x63f   : > { %v2508_v23 = vld [vmem:[%s2736_s15 + $0x20] sm:$0xff]   ;;  %v2510_v26 = vld [vmem:[%s2736_s15 + $0x10] sm:$0xff]  }
 0x640   : > { %v1715_v35 = vcombine.low %v1687_v24, %v1694_v29  ;;  %v2293_v36 = vcombine.high %v1687_v24, %v1694_v29  ;;  %v1731_v38 = vcombine.low %v1703_v32, %v1710_v33  ;;  %v2294_v31 = vcombine.high %v1703_v32, %v1710_v33  ;;  %v2511_v24 = vld [vmem:[%s2736_s15 + $0x8] sm:$0xff]   ;;  %v2512_v29 = vld [vmem:[%s2736_s15] sm:$0xff]  }
 0x641   : > { %v2301_v32 = vld [vmem:[%s586_s4] ss:$0 sm:$0xff] }
 0x642   : > { %v1722_v30 = vrot.slane %v1715_v35, %v2803_v42  ;;  %v1730_v43 = vrot.slane %v2293_v36, %v2803_v42  ;;  %v1738_v44 = vrot.slane %v1731_v38, %v2803_v42  ;;  %v1746_v46 = vrot.slane %v2294_v31, %v2803_v42 }
 0x644   : > { %v1748_v47 = vcombine.high %v1722_v30, %v1730_v43  ;;  %v1764_v48 = vcombine.high %v1738_v44, %v1746_v46  ;;  %v1747_v49 = vcombine.low %v1722_v30, %v1730_v43  ;;  %v1763_v50 = vcombine.low %v1738_v44, %v1746_v46 }
 0x646   : > { %v1762_v51 = vrot.slane %v1748_v47, %v2807_v45  ;;  %v1778_v27 = vrot.slane %v1764_v48, %v2807_v45  ;;  %v1755_v25 = vrot.slane %v1747_v49, %v2807_v45  ;;  %v1771_v55 = vrot.slane %v1763_v50, %v2807_v45 }
 0x648   : > { %v1781_v52 = vcombine.low %v1762_v51, %v1778_v27  ;;  %v1780_v28 = vcombine.high %v1755_v25, %v1771_v55  ;;  %v1779_v53 = vcombine.low %v1755_v25, %v1771_v55  ;;  %v1782_v42 = vcombine.high %v1762_v51, %v1778_v27  ;;  %v2305_v51 = vld [vmem:[%s594_s20] ss:$0 sm:$0xff] }
 0x64a   : > { %1788 = vrot.lane.b32.xlu1 %v1781_v52, %s2585_s19  ;;  %1784 = vrot.lane.b32.xlu0 %v1780_v28, %s2586_s27 }
 0x64e   : > { %1792 = vrot.lane.b32.xlu1 %v1782_v42, %s2587_s0 }
 0x6bc   : > { %v1789_v54 = vpop.permute.xlu1 %1788  ;;  %v1785_v56 = vpop.permute.xlu0 %1784 }
 0x6bd   : > { %v1795_v57 = vsel %vm1218_vm3, %v1779_v53, %v1785_v56 }
 0x6be   : > { %v1797_v59 = vsel %vm1796_vm6, %v1795_v57, %v1789_v54 }
 0x6c0   : > { %v1793_v58 = vpop.permute.xlu1 %1792 }
 0x6c1   : > { %v1799_v45 = vsel %vm1798_vm7, %v1797_v59, %v1793_v58 }
 0x6c2   : > { %v1800_v60 = vpack.c.bf16 %v1799_v45, %v1799_v45 }
 0x6c4   : > { %2415 = vmatmul.mubr.msk.bf16.vlgmr.msra.gmra.mxu1 %vm611_vm1, %v1800_v60 }
 0x6c5   : > { %2442 = vmatprep.mubr.msk.bf16.mxu1 %vm2576_vm2, %v2575_v10  ;;  %2427 = vmatpush3.bf16.msra.mxu1 %v2505_v20 }
 0x6c6   : > { %2428 = vmatprep.subr.bf16.mxu1 %v2575_v10 }
 0x6c9   : > { %2429 = vmatpush3.bf16.msra.mxu1 %v2506_v21 }
 0x6ca   : > { %2430 = vmatprep.subr.bf16.mxu1 %v2575_v10 }
 0x6cd   : > { %2431 = vmatpush3.bf16.msra.mxu1 %v2507_v22 }
 0x6ce   : > { %2432 = vmatprep.subr.bf16.mxu1 %v2575_v10 }
 0x6d1   : > { %2433 = vmatpush3.bf16.msra.mxu1 %v2508_v23 }
 0x6d2   : > { %2434 = vmatprep.subr.bf16.mxu1 %v2575_v10 }
 0x6d5   : > { %2435 = vmatpush3.bf16.msra.mxu1 %v2509_v39 }
 0x6d6   : > { %2436 = vmatprep.subr.bf16.mxu1 %v2575_v10 }
 0x6d9   : > { %2437 = vmatpush3.bf16.msra.mxu1 %v2510_v26 }
 0x6da   : > { %2438 = vmatprep.subr.bf16.mxu1 %v2575_v10 }
 0x6dd   : > { %2439 = vmatpush3.bf16.msra.mxu1 %v2511_v24 }
 0x6de   : > { %2440 = vmatprep.subr.bf16.mxu1 %v2575_v10 }
 0x6e1   : > { %2441 = vmatpush3.bf16.msra.mxu1 %v2512_v29 }
 0x784   : > { %v1861_v62 = vpop.f32.mrf.mxu1 }
 0x785   : > { %v1862_v63 = vadd.f32 %v2295_v61, %v1861_v62 }
 0x786   : > { %v2416_v0 = vpop.f32.mrf.mxu1 }
 0x787   : > { %v2977_v1 = vadd.f32 %v1862_v63, %v2750_v2  ;;  %v2504_v2 = vld [vmem:[%s2726_s3] sm:$0xff]   ;;  %s3075_s3 = scalar_lea.vmem %s3046_s7, %s2687_s28 }
 0x788   : > { %v1864_v37 = vpop.f32.mrf.mxu1  ;;  %2421 = vmatpush3.bf16.msra.mxu0 %v2504_v2  ;;  %v2300_v16 = vld [vmem:[%s3075_s3] ss:$0 sm:$0xff] }
 0x789   : > { %v1870_v34 = vsel %vm611_vm1, %v2977_v1, 0.0 }
 0x78a   : > { %1871 = vadd.xlane.f32.xlu0 %v1870_v34  ;;  %v2417_v3 = vpop.f32.mrf.mxu1 }
 0x813   : > { %v1872_v4 = vpop.xlane.xlu0 %1871 }
 0x814   : > { %v1873_v5 = vmul.f32 0.03125, %v1872_v4 }
 0x816   : > { %v1874_v6 = vsub.f32 %v2977_v1, %v1873_v5 }
 0x818   : > { %v1875_v7 = vmul.f32 %v1874_v6, %v1874_v6 }
 0x81a   : > { %v1876_v8 = vsel %vm611_vm1, %v1875_v7, 0.0 }
 0x81b   : > { %1877 = vadd.xlane.f32.xlu1 %v1876_v8 }
 0x8a4   : > { %v1878_v9 = vpop.xlane.xlu1 %1877 }
 0x8a5   : > { %v1879_v11 = vmul.f32 0.03125, %v1878_v9 }
 0x8a7   : > { %v1880_v12 = vadd.f32 1e-05, %v1879_v11 }
 0x8a9   : > { %2531 = vrsqrt.f32 %v1880_v12 }
 0x8b6   : > { %v2532_v13 = vpop.eup %2531 }
 0x8b7   : > { %v1882_v15 = vmul.f32 %v2532_v13, %v1874_v6 }
 0x8b9   : > { %v1889_v17 = vmul.f32 %v2299_v14, %v1882_v15 }
 0x8bb   : > { %v1896_v18 = vadd.f32 %v2300_v16, %v1889_v17 }
 0x8bd   : > { %v1897_v19 = vpack.c.bf16 %v1896_v18, %v1896_v18 }
 0x8bf   : > { %2423 = vmatmul.mubr.msk.bf16.vlgmr.msra.gmra.mxu0 %vm611_vm1, %v1897_v19 }
 0x97f   : > { %v1958_v33 = vpop.f32.mrf.mxu0 }
 0x980   : > { %v1959_v35 = vadd.f32 %v2301_v32, %v1958_v33 }
 0x981   : > { %v2424_v36 = vpop.f32.mrf.mxu0 }
 0x982   : > { %v1964_v38 = vmul.f32 %v1959_v35, %v1959_v35 }
 0x983   : > { %v1961_v31 = vpop.f32.mrf.mxu0 }
 0x984   : > { %v1965_v41 = vmul.f32 %v1964_v38, %v1959_v35 }
 0x985   : > { %v2425_v30 = vpop.f32.mrf.mxu0 }
 0x986   : > { %v1966_v43 = vmul.f32 0.044715, %v1965_v41 }
 0x988   : > { %v1967_v44 = vadd.f32 %v1966_v43, %v1959_v35 }
 0x98a   : > { %v1968_v46 = vmul.f32 0.7978846, %v1967_v44 }
 0x98c   : > { %2533 = vtanh.f32 %v1968_v46 }
 0x999   : > { %v2534_v10 = vpop.eup %2533 }
 0x99a   : > { %v1970_v47 = vadd.f32 1.0, %v2534_v10 }
 0x99c   : > { %v1971_v48 = vmul.f32 0.5, %v1970_v47 }
 0x99e   : > { %v1972_v49 = vmul.f32 %v1971_v48, %v1959_v35 }
 0x9a0   : > { %v1973_v50 = vpack.c.bf16 %v1972_v49, %v1972_v49 }
 0x9a2   : > { %2443 = vmatmul.mubr.bf16.vlgmr.msra.gmra.mxu1 %v1973_v50 }
 0xa62   : > { %v2079_v27 = vpop.f32.mrf.mxu1 }
 0xa63   : > { %v2080_v25 = vadd.f32 %v2305_v51, %v2079_v27 }
 0xa64   : > { %v2444_v55 = vpop.f32.mrf.mxu1 }
 0xa65   : > { %v2085_v52 = vadd.f32 %v2080_v25, %v2977_v1 }
 0xa66   : > { %v2082_v28 = vpop.f32.mrf.mxu1 }
 0xa67   : > { %v2086_v53 = vpack.c.bf16 %v2085_v52, %v2085_v52 }
 0xa68   : > { %v2445_v42 = vpop.f32.mrf.mxu1 }
 0xa69   : > { %2088 = vst.msk [vmem:[%s2745_s24] sm:$0xf] %vm2087_vm8, %v2086_v53 }
 0xa6a PF: > { %s3076_s13 = sld [smem:[#allocation5_spill]] }
 0xa6b   : > { %s3077_s21 = sld [smem:[#allocation3_spill]] }
 0xa6c   : > { %s3078_s22 = sld [smem:[#allocation4_spill]] }
 0xa6d   : > { %s3079_s23 = sld [smem:[#allocation6_spill]] }
 0xa6e   : > { %s3080_s24 = sld [smem:[#allocation7_spill]] }
 0xa70   : > { %s22_s25 = sadd.s32 1, %s3076_s13  }
 0xa71   : > { %p19_p8 = scmp.ge.s32.totalorder %s22_s25, 6  }
 0xa73   :  { %21 = sbr.rel (!%p19_p8) target bundleno = 4 (0x4), region = 135 }

</bundles_post_ra>
